<compile_context>
chip_gen: v7x
topology: tpu7x:2x2x1
jax: 0.10.0
libtpu: 0.0.40
codegen_flags: <defaults>
</compile_context>

<pallas_src>
import jax
import jax.numpy as jnp
from jax.experimental import pallas as pl
from jax.experimental.pallas import tpu as pltpu

LAYER_DIMS = [784, 512, 256, 128, 64, 10]
PAD_H4 = 128   # layer-4 output width padded 64 -> 128 (lane-dense K for last layer)
PAD_OUT = 128  # logits padded 10 -> 128 (lane-dense output block, unmasked vst)


def _round_up(n, m):
    return ((n + m - 1) // m) * m


def _choose_tile(n):
    """Adaptive batch tile.

    - n <= 256: tile = round_up(n, 8) so tiny batches don't pay for 256 rows
      of MXU work / DMA (still satisfies the (8,128) block divisibility rule).
    - n  > 256: tile in [256, 1024] chosen so the grid has at least 2 steps
      (v7x dual-TensorCore sharding via the 'parallel' axis) while amortizing
      the ~0.35 us fixed per-grid-step overhead.
    """
    n8 = _round_up(max(int(n), 1), 8)
    if n8 <= 256:
        return n8
    half = _round_up(pl.cdiv(n8, 2), 8)
    return int(min(1024, max(256, half)))


def _mlp_kernel(x_ref,
                w1_ref, b1_ref,
                w2_ref, b2_ref,
                w3_ref, b3_ref,
                w4_ref, b4_ref,
                w5_ref, b5_ref,
                o_ref):
    # x_ref: (TILE_N, 784) f32. Cast to bf16 in-kernel (VPU op hidden under
    # the MXU chain) so the wrapper never makes a separate cast pass over HBM.
    h = x_ref[...].astype(jnp.bfloat16)

    h = jnp.dot(h, w1_ref[...], preferred_element_type=jnp.float32) + b1_ref[...]
    h = jnp.maximum(h, 0.0).astype(jnp.bfloat16)      # single cast per layer
    h = jnp.dot(h, w2_ref[...], preferred_element_type=jnp.float32) + b2_ref[...]
    h = jnp.maximum(h, 0.0).astype(jnp.bfloat16)
    h = jnp.dot(h, w3_ref[...], preferred_element_type=jnp.float32) + b3_ref[...]
    h = jnp.maximum(h, 0.0).astype(jnp.bfloat16)
    h = jnp.dot(h, w4_ref[...], preferred_element_type=jnp.float32) + b4_ref[...]
    h = jnp.maximum(h, 0.0).astype(jnp.bfloat16)

    # Final layer: logits (padded to 128 lanes), no activation, stored f32.
    o_ref[...] = (jnp.dot(h, w5_ref[...], preferred_element_type=jnp.float32)
                  + b5_ref[...])


def init_params(key):
    """Deterministic init mimicking nn.Linear default (uniform +/- 1/sqrt(fan_in)).

    Stored as (in_features, out_features) so the kernel computes y = x @ W + b
    (transpose of PyTorch's (out, in) layout, numerically identical forward).
    """
    params = []
    for i in range(len(LAYER_DIMS) - 1):
        fan_in, fan_out = LAYER_DIMS[i], LAYER_DIMS[i + 1]
        key, kw, kb = jax.random.split(key, 3)
        bound = 1.0 / jnp.sqrt(jnp.float32(fan_in))
        w = jax.random.uniform(kw, (fan_in, fan_out), jnp.float32, -bound, bound)
        b = jax.random.uniform(kb, (1, fan_out), jnp.float32, -bound, bound)
        params.append((w, b))
    return params


def _prep_padded_params(params):
    """Cast weights to bf16 and zero-pad layer 4 (64->128) and logits (10->128).

    Zero padding preserves semantics: padded layer-4 columns produce
    relu(0) = 0, and the padded w5 rows/columns are zero, so logits[:, :10]
    are the same computation as the unpadded network.
    """
    (w1, b1), (w2, b2), (w3, b3), (w4, b4), (w5, b5) = params
    w1b, w2b, w3b = (w.astype(jnp.bfloat16) for w in (w1, w2, w3))
    w4p = jnp.pad(w4, ((0, 0), (0, PAD_H4 - w4.shape[1]))).astype(jnp.bfloat16)
    b4p = jnp.pad(b4, ((0, 0), (0, PAD_H4 - b4.shape[1])))
    w5p = jnp.pad(w5, ((0, PAD_H4 - w5.shape[0]),
                       (0, PAD_OUT - w5.shape[1]))).astype(jnp.bfloat16)
    b5p = jnp.pad(b5, ((0, 0), (0, PAD_OUT - b5.shape[1])))
    return [w1b, b1, w2b, b2, w3b, b3, w4p, b4p, w5p, b5p]


def mlp_forward(x, params):
    """x: (N, 1, 28, 28) or any shape flattening to (N, 784). Returns (N, 10) f32."""
    x2d = x.reshape(-1, LAYER_DIMS[0]).astype(jnp.float32)
    n = x2d.shape[0]

    tile_n = _choose_tile(n)
    n_pad = _round_up(n, tile_n)
    if n_pad != n:                       # aligned batches skip the pad copy
        x2d = jnp.pad(x2d, ((0, n_pad - n), (0, 0)))

    flat = _prep_padded_params(params)

    # Weights/biases: whole-array blocks, invariant across the batch grid axis
    # -> DMA'd once and kept VMEM-resident.
    weight_specs = [pl.BlockSpec(p.shape, lambda i: (0, 0)) for p in flat]

    flops = 2 * n_pad * sum(int(flat[j].shape[0]) * int(flat[j].shape[1])
                            for j in range(0, len(flat), 2))
    bytes_accessed = (sum(int(p.size) * p.dtype.itemsize for p in flat)
                      + n_pad * (LAYER_DIMS[0] * 4 + PAD_OUT * 4))

    out = pl.pallas_call(
        _mlp_kernel,
        out_shape=jax.ShapeDtypeStruct((n_pad, PAD_OUT), jnp.float32),
        grid=(n_pad // tile_n,),
        in_specs=[pl.BlockSpec((tile_n, LAYER_DIMS[0]), lambda i: (i, 0))]
                 + weight_specs,
        out_specs=pl.BlockSpec((tile_n, PAD_OUT), lambda i: (i, 0)),
        compiler_params=pltpu.CompilerParams(
            dimension_semantics=("parallel",),
            vmem_limit_bytes=32 * 1024 * 1024),
        cost_estimate=pl.CostEstimate(flops=flops,
                                      transcendentals=0,
                                      bytes_accessed=bytes_accessed),
    )(x2d, *flat)

    return out[:n, :LAYER_DIMS[-1]]


def _reference(x, params):
    """Pure-JAX reference matching the kernel's bf16/f32-accumulate numerics."""
    h = x.reshape(-1, LAYER_DIMS[0]).astype(jnp.float32).astype(jnp.bfloat16)
    for i, (w, b) in enumerate(params):
        h = jnp.dot(h, w.astype(jnp.bfloat16),
                    preferred_element_type=jnp.float32) + b
        if i < len(params) - 1:
            h = jnp.maximum(h, 0.0).astype(jnp.bfloat16)
    return h


if __name__ == "__main__":
    key = jax.random.PRNGKey(0)
    kx, kp = jax.random.split(key)

    # Small MNIST-like batch: (N=2, C=1, H=28, W=28) -> flattens to (2, 784).
    x = jax.random.normal(kx, (2, 1, 28, 28), dtype=jnp.float32)
    params = init_params(kp)

    out = mlp_forward(x, params)
    out = jax.block_until_ready(out)

    ref = _reference(x, params)
    assert out.shape == (2, 10), out.shape
    assert jnp.allclose(out, ref, atol=1e-2, rtol=1e-2), "mismatch vs reference"

    print("KERNEL_OK")
</pallas_src>

<mosaic_0001>
module attributes {stable_mosaic.version = 11 : i64} {
  func.func @_mlp_kernel(%arg0: i32, %arg1: memref<8x784xf32, #tpu.memory_space<vmem>>, %arg2: memref<784x512xbf16, #tpu.memory_space<vmem>>, %arg3: memref<1x512xf32, #tpu.memory_space<vmem>>, %arg4: memref<512x256xbf16, #tpu.memory_space<vmem>>, %arg5: memref<1x256xf32, #tpu.memory_space<vmem>>, %arg6: memref<256x128xbf16, #tpu.memory_space<vmem>>, %arg7: memref<1x128xf32, #tpu.memory_space<vmem>>, %arg8: memref<128x128xbf16, #tpu.memory_space<vmem>>, %arg9: memref<1x128xf32, #tpu.memory_space<vmem>>, %arg10: memref<128x128xbf16, #tpu.memory_space<vmem>>, %arg11: memref<1x128xf32, #tpu.memory_space<vmem>>, %arg12: memref<8x128xf32, #tpu.memory_space<vmem>>) attributes {dimension_semantics = [#tpu.dimension_semantics<parallel>], iteration_bounds = array<i64: 1>, scalar_prefetch = 0 : i64, scratch_operands = 0 : i64, tpu.core_type = #tpu.core_type<tc>, window_params = [{transform_indices = @transform_0, window_bounds = array<i64: 8, 784>}, {pipeline_mode = #tpu.pipeline_mode<synchronous>, transform_indices = @transform_1, window_bounds = array<i64: 784, 512>}, {pipeline_mode = #tpu.pipeline_mode<synchronous>, transform_indices = @transform_2, window_bounds = array<i64: 1, 512>}, {pipeline_mode = #tpu.pipeline_mode<synchronous>, transform_indices = @transform_3, window_bounds = array<i64: 512, 256>}, {pipeline_mode = #tpu.pipeline_mode<synchronous>, transform_indices = @transform_4, window_bounds = array<i64: 1, 256>}, {pipeline_mode = #tpu.pipeline_mode<synchronous>, transform_indices = @transform_5, window_bounds = array<i64: 256, 128>}, {pipeline_mode = #tpu.pipeline_mode<synchronous>, transform_indices = @transform_6, window_bounds = array<i64: 1, 128>}, {pipeline_mode = #tpu.pipeline_mode<synchronous>, transform_indices = @transform_7, window_bounds = array<i64: 128, 128>}, {pipeline_mode = #tpu.pipeline_mode<synchronous>, transform_indices = @transform_8, window_bounds = array<i64: 1, 128>}, {pipeline_mode = #tpu.pipeline_mode<synchronous>, transform_indices = @transform_9, window_bounds = array<i64: 128, 128>}, {pipeline_mode = #tpu.pipeline_mode<synchronous>, transform_indices = @transform_10, window_bounds = array<i64: 1, 128>}, {transform_indices = @transform_11, window_bounds = array<i64: 8, 128>}]} {
    %c0 = arith.constant 0 : index
    %c0_0 = arith.constant 0 : index
    %0 = vector.load %arg1[%c0, %c0_0] : memref<8x784xf32, #tpu.memory_space<vmem>>, vector<8x784xf32>
    %1 = arith.truncf %0 : vector<8x784xf32> to vector<8x784xbf16>
    %c0_1 = arith.constant 0 : index
    %c0_2 = arith.constant 0 : index
    %2 = vector.load %arg2[%c0_1, %c0_2] : memref<784x512xbf16, #tpu.memory_space<vmem>>, vector<784x512xbf16>
    %cst = arith.constant dense<0.000000e+00> : vector<8x512xf32>
    %3 = tpu.matmul %1, %2, %cst {dimension_numbers = #tpu.dot_dimension_numbers<[1], [0], [0], [1], [0, 0, 1, 1], [], []>} : vector<8x784xbf16>, vector<784x512xbf16>, vector<8x512xf32> -> vector<8x512xf32>
    %c0_3 = arith.constant 0 : index
    %c0_4 = arith.constant 0 : index
    %4 = vector.load %arg3[%c0_3, %c0_4] : memref<1x512xf32, #tpu.memory_space<vmem>>, vector<1x512xf32>
    %5 = vector.broadcast %4 : vector<1x512xf32> to vector<8x512xf32>
    %6 = arith.addf %3, %5 : vector<8x512xf32>
    %cst_5 = arith.constant 0.000000e+00 : f32
    %7 = vector.broadcast %cst_5 : f32 to vector<8x512xf32>
    %8 = arith.maximumf %6, %7 : vector<8x512xf32>
    %9 = arith.truncf %8 : vector<8x512xf32> to vector<8x512xbf16>
    %c0_6 = arith.constant 0 : index
    %c0_7 = arith.constant 0 : index
    %10 = vector.load %arg4[%c0_6, %c0_7] : memref<512x256xbf16, #tpu.memory_space<vmem>>, vector<512x256xbf16>
    %cst_8 = arith.constant dense<0.000000e+00> : vector<8x256xf32>
    %11 = tpu.matmul %9, %10, %cst_8 {dimension_numbers = #tpu.dot_dimension_numbers<[1], [0], [0], [1], [0, 0, 1, 1], [], []>} : vector<8x512xbf16>, vector<512x256xbf16>, vector<8x256xf32> -> vector<8x256xf32>
    %c0_9 = arith.constant 0 : index
    %c0_10 = arith.constant 0 : index
    %12 = vector.load %arg5[%c0_9, %c0_10] : memref<1x256xf32, #tpu.memory_space<vmem>>, vector<1x256xf32>
    %13 = vector.broadcast %12 : vector<1x256xf32> to vector<8x256xf32>
    %14 = arith.addf %11, %13 : vector<8x256xf32>
    %cst_11 = arith.constant 0.000000e+00 : f32
    %15 = vector.broadcast %cst_11 : f32 to vector<8x256xf32>
    %16 = arith.maximumf %14, %15 : vector<8x256xf32>
    %17 = arith.truncf %16 : vector<8x256xf32> to vector<8x256xbf16>
    %c0_12 = arith.constant 0 : index
    %c0_13 = arith.constant 0 : index
    %18 = vector.load %arg6[%c0_12, %c0_13] : memref<256x128xbf16, #tpu.memory_space<vmem>>, vector<256x128xbf16>
    %cst_14 = arith.constant dense<0.000000e+00> : vector<8x128xf32>
    %19 = tpu.matmul %17, %18, %cst_14 {dimension_numbers = #tpu.dot_dimension_numbers<[1], [0], [0], [1], [0, 0, 1, 1], [], []>} : vector<8x256xbf16>, vector<256x128xbf16>, vector<8x128xf32> -> vector<8x128xf32>
    %c0_15 = arith.constant 0 : index
    %c0_16 = arith.constant 0 : index
    %20 = vector.load %arg7[%c0_15, %c0_16] : memref<1x128xf32, #tpu.memory_space<vmem>>, vector<1x128xf32>
    %21 = vector.broadcast %20 : vector<1x128xf32> to vector<8x128xf32>
    %22 = arith.addf %19, %21 : vector<8x128xf32>
    %cst_17 = arith.constant 0.000000e+00 : f32
    %23 = vector.broadcast %cst_17 : f32 to vector<8x128xf32>
    %24 = arith.maximumf %22, %23 : vector<8x128xf32>
    %25 = arith.truncf %24 : vector<8x128xf32> to vector<8x128xbf16>
    %c0_18 = arith.constant 0 : index
    %c0_19 = arith.constant 0 : index
    %26 = vector.load %arg8[%c0_18, %c0_19] : memref<128x128xbf16, #tpu.memory_space<vmem>>, vector<128x128xbf16>
    %cst_20 = arith.constant dense<0.000000e+00> : vector<8x128xf32>
    %27 = tpu.matmul %25, %26, %cst_20 {dimension_numbers = #tpu.dot_dimension_numbers<[1], [0], [0], [1], [0, 0, 1, 1], [], []>} : vector<8x128xbf16>, vector<128x128xbf16>, vector<8x128xf32> -> vector<8x128xf32>
    %c0_21 = arith.constant 0 : index
    %c0_22 = arith.constant 0 : index
    %28 = vector.load %arg9[%c0_21, %c0_22] : memref<1x128xf32, #tpu.memory_space<vmem>>, vector<1x128xf32>
    %29 = vector.broadcast %28 : vector<1x128xf32> to vector<8x128xf32>
    %30 = arith.addf %27, %29 : vector<8x128xf32>
    %cst_23 = arith.constant 0.000000e+00 : f32
    %31 = vector.broadcast %cst_23 : f32 to vector<8x128xf32>
    %32 = arith.maximumf %30, %31 : vector<8x128xf32>
    %33 = arith.truncf %32 : vector<8x128xf32> to vector<8x128xbf16>
    %c0_24 = arith.constant 0 : index
    %c0_25 = arith.constant 0 : index
    %34 = vector.load %arg10[%c0_24, %c0_25] : memref<128x128xbf16, #tpu.memory_space<vmem>>, vector<128x128xbf16>
    %cst_26 = arith.constant dense<0.000000e+00> : vector<8x128xf32>
    %35 = tpu.matmul %33, %34, %cst_26 {dimension_numbers = #tpu.dot_dimension_numbers<[1], [0], [0], [1], [0, 0, 1, 1], [], []>} : vector<8x128xbf16>, vector<128x128xbf16>, vector<8x128xf32> -> vector<8x128xf32>
    %c0_27 = arith.constant 0 : index
    %c0_28 = arith.constant 0 : index
    %36 = vector.load %arg11[%c0_27, %c0_28] : memref<1x128xf32, #tpu.memory_space<vmem>>, vector<1x128xf32>
    %37 = vector.broadcast %36 : vector<1x128xf32> to vector<8x128xf32>
    %38 = arith.addf %35, %37 : vector<8x128xf32>
    %c0_29 = arith.constant 0 : index
    %c0_30 = arith.constant 0 : index
    %39 = vector.load %arg12[%c0_29, %c0_30] : memref<8x128xf32, #tpu.memory_space<vmem>>, vector<8x128xf32>
    tpu.vector_store %arg12[%c0_29, %c0_30], %38 {strides = array<i32>} : memref<8x128xf32, #tpu.memory_space<vmem>>, vector<8x128xf32>,
    return
  }
  func.func @transform_0(%arg0: i32) -> (i32, i32) {
    %c0_i32 = arith.constant 0 : i32
    %c0_i32_0 = arith.constant 0 : i32
    return %arg0, %c0_i32 : i32, i32
  }
  func.func @transform_1(%arg0: i32) -> (i32, i32) {
    %c0_i32 = arith.constant 0 : i32
    %c0_i32_0 = arith.constant 0 : i32
    %c0_i32_1 = arith.constant 0 : i32
    return %c0_i32, %c0_i32_0 : i32, i32
  }
  func.func @transform_2(%arg0: i32) -> (i32, i32) {
    %c0_i32 = arith.constant 0 : i32
    %c0_i32_0 = arith.constant 0 : i32
    %c0_i32_1 = arith.constant 0 : i32
    return %c0_i32, %c0_i32_0 : i32, i32
  }
  func.func @transform_3(%arg0: i32) -> (i32, i32) {
    %c0_i32 = arith.constant 0 : i32
    %c0_i32_0 = arith.constant 0 : i32
    %c0_i32_1 = arith.constant 0 : i32
    return %c0_i32, %c0_i32_0 : i32, i32
  }
  func.func @transform_4(%arg0: i32) -> (i32, i32) {
    %c0_i32 = arith.constant 0 : i32
    %c0_i32_0 = arith.constant 0 : i32
    %c0_i32_1 = arith.constant 0 : i32
    return %c0_i32, %c0_i32_0 : i32, i32
  }
  func.func @transform_5(%arg0: i32) -> (i32, i32) {
    %c0_i32 = arith.constant 0 : i32
    %c0_i32_0 = arith.constant 0 : i32
    %c0_i32_1 = arith.constant 0 : i32
    return %c0_i32, %c0_i32_0 : i32, i32
  }
  func.func @transform_6(%arg0: i32) -> (i32, i32) {
    %c0_i32 = arith.constant 0 : i32
    %c0_i32_0 = arith.constant 0 : i32
    %c0_i32_1 = arith.constant 0 : i32
    return %c0_i32, %c0_i32_0 : i32, i32
  }
  func.func @transform_7(%arg0: i32) -> (i32, i32) {
    %c0_i32 = arith.constant 0 : i32
    %c0_i32_0 = arith.constant 0 : i32
    %c0_i32_1 = arith.constant 0 : i32
    return %c0_i32, %c0_i32_0 : i32, i32
  }
  func.func @transform_8(%arg0: i32) -> (i32, i32) {
    %c0_i32 = arith.constant 0 : i32
    %c0_i32_0 = arith.constant 0 : i32
    %c0_i32_1 = arith.constant 0 : i32
    return %c0_i32, %c0_i32_0 : i32, i32
  }
  func.func @transform_9(%arg0: i32) -> (i32, i32) {
    %c0_i32 = arith.constant 0 : i32
    %c0_i32_0 = arith.constant 0 : i32
    %c0_i32_1 = arith.constant 0 : i32
    return %c0_i32, %c0_i32_0 : i32, i32
  }
  func.func @transform_10(%arg0: i32) -> (i32, i32) {
    %c0_i32 = arith.constant 0 : i32
    %c0_i32_0 = arith.constant 0 : i32
    %c0_i32_1 = arith.constant 0 : i32
    return %c0_i32, %c0_i32_0 : i32, i32
  }
  func.func @transform_11(%arg0: i32) -> (i32, i32) {
    %c0_i32 = arith.constant 0 : i32
    %c0_i32_0 = arith.constant 0 : i32
    return %arg0, %c0_i32 : i32, i32
  }
}

</mosaic_0001>

<bundles_post_ra>
// kernel: tpu_custom_call.1
= control target key start
LH: loop header
LB: loop body
LE: loop exit
PB: predicated region body
PF: predicated region fallthrough
CT: control target
= control target key end

     0   :  { %16 = vsyncpa [#allocation3], 0  ;;  %s3835_s0 = inlined_call_operand.hbm [shape: f32[8,784], index: 0, kind: input, shape index: {}]   ;;  %s3836_s1 = inlined_call_operand.hbm [shape: bf16[784,512], index: 1, kind: input, shape index: {}]   ;;  %s3837_s2 = inlined_call_operand.vmem [shape: f32[1,512], index: 2, kind: input, shape index: {}]   ;;  %s3838_s3 = inlined_call_operand.hbm [shape: bf16[512,256], index: 3, kind: input, shape index: {}]   ;;  %s3839_s4 = inlined_call_operand.vmem [shape: f32[1,256], index: 4, kind: input, shape index: {}]   ;;  %s3840_s5 = inlined_call_operand.hbm [shape: bf16[256,128], index: 5, kind: input, shape index: {}]   ;;  %s3841_s6 = inlined_call_operand.vmem [shape: f32[1,128], index: 6, kind: input, shape index: {}]   ;;  %s3842_s7 = inlined_call_operand.hbm [shape: bf16[128,128], index: 7, kind: input, shape index: {}]   ;;  %s3843_s8 = inlined_call_operand.vmem [shape: f32[1,128], index: 8, kind: input, shape index: {}]   ;;  %s3844_s9 = inlined_call_operand.hbm [shape: bf16[128,128], index: 9, kind: input, shape index: {}]   ;;  %s3845_s10 = inlined_call_operand.vmem [shape: f32[1,128], index: 10, kind: input, shape index: {}]   ;;  %s3846_s11 = inlined_call_operand.hbm [shape: f32[8,128], index: 11, kind: output, shape index: {}]  }
   0x1   :  { %17 = vsyncpa [#allocation6], 0 }
   0x2   :  { %18 = vsyncpa [#allocation9], 0 }
   0x3   :  { %19 = vsyncpa [#allocation12], 0 }
   0x4   :  { %20 = vsyncpa [#allocation4], 0  ;;  %s3585_s17 = smov [#allocation5]   ;;  %s3421_s21 = scalar_lea.hbm %s3836_s1, 25088 }
   0x5   :  { %s36_s18 = sshll.u32 %s3585_s17, 4  ;;  %p3422_p0 = scmp.ne.s32.totalorder %s3836_s1, %s3421_s21  ;;  %s37_s18 = int_to_ptr.vmem [resolvable:$true] %s36_s18 }
   0x6   :  { %p3425_p1 = scmp.lt.u32.totalorder %s3421_s21, %s3836_s1 }
   0x8   :  { %p3427_p2 = pnand %p3425_p1, %p3422_p0 }
   0xa   :  { %3430 = shalt.err (!%p3427_p2)
}
   0xb   :  { %s3431_s26 = scalar_lea.vmem %s37_s18, 25088  ;;  %p3436_p4 = scmp.lt.s32.totalorder %s37_s18, %s37_s18 }
   0xc   :  { %p3432_p3 = scmp.ne.s32.totalorder %s37_s18, %s3431_s26  ;;  %p3437_p5 = scmp.lt.s32.totalorder %s3431_s26, %s3431_s26 }
   0xe   :  { %p3438_p6 = por %p3437_p5, %p3436_p4 }
  0x10   :  { %p3439_p7 = pnand %p3438_p6, %p3432_p3 }
  0x12   :  { %3442 = shalt.err (!%p3439_p7)
}
  0x13   :  { %s3586_s27 = smov 256   ;;  %s3587_s28 = smov 16  }
  0x14   :  { %42 = dma.hbm_to_vmem [thread:$0]  %s3836_s1, 25088, %s37_s18, [#allocation6], %s3586_s27, %s3586_s27, %s3587_s28  }
  0x15   :  { %s3588_s12 = smov [#allocation8]   ;;  %s3443_s16 = scalar_lea.hbm %s3840_s5, 2048 }
  0x16   :  { %s64_s13 = sshll.u32 %s3588_s12, 4  ;;  %p3444_p8 = scmp.ne.s32.totalorder %s3840_s5, %s3443_s16  ;;  %s65_s13 = int_to_ptr.vmem [resolvable:$true] %s64_s13 }
  0x17   :  { %p3447_p9 = scmp.lt.u32.totalorder %s3443_s16, %s3840_s5 }
  0x19   :  { %p3449_p10 = pnand %p3447_p9, %p3444_p8 }
  0x1b   :  { %3452 = shalt.err (!%p3449_p10)
}
  0x1c   :  { %s3453_s22 = scalar_lea.vmem %s65_s13, 2048  ;;  %p3458_p12 = scmp.lt.s32.totalorder %s65_s13, %s65_s13 }
  0x1d   :  { %p3454_p11 = scmp.ne.s32.totalorder %s65_s13, %s3453_s22  ;;  %p3459_p13 = scmp.lt.s32.totalorder %s3453_s22, %s3453_s22 }
  0x1f   :  { %p3460_p0 = por %p3459_p13, %p3458_p12 }
  0x21   :  { %p3461_p1 = pnand %p3460_p0, %p3454_p11 }
  0x23   :  { %3464 = shalt.err (!%p3461_p1)
}
  0x24   :  { %s3589_s1 = smov 64   ;;  %s3590_s18 = smov 4  }
  0x25   :  { %70 = dma.hbm_to_vmem [thread:$0]  %s3840_s5, 2048, %s65_s13, [#allocation9], %s3589_s1, %s3589_s1, %s3590_s18  }
  0x26   :  { %s3591_s25 = smov [#allocation2]   ;;  %s3592_s27 = smov [#allocation7]  }
  0x27   :  { %s27_s26 = sshll.u32 %s3591_s25, 4  ;;  %s50_s28 = sshll.u32 %s3592_s27, 4  ;;  %s28_s26 = int_to_ptr.vmem [resolvable:$true] %s27_s26  ;;  %s3688_s28 = int_to_ptr.vmem [resolvable:$true] %s50_s28 }
  0x28   :  { %s3465_s12 = scalar_lea.hbm %s3835_s0, 896 }
  0x29   :  { %p3466_p2 = scmp.ne.s32.totalorder %s3835_s0, %s3465_s12  ;;  %p3469_p3 = scmp.lt.u32.totalorder %s3465_s12, %s3835_s0 }
  0x2b   :  { %p3471_p4 = pnand %p3469_p3, %p3466_p2 }
  0x2d   :  { %3474 = shalt.err (!%p3471_p4)
}
  0x2e   :  { %s3475_s5 = scalar_lea.vmem %s28_s26, 896  ;;  %p3480_p6 = scmp.lt.s32.totalorder %s28_s26, %s28_s26 }
  0x2f   :  { %p3476_p5 = scmp.ne.s32.totalorder %s28_s26, %s3475_s5  ;;  %p3481_p7 = scmp.lt.s32.totalorder %s3475_s5, %s3475_s5 }
  0x31   :  { %p3482_p8 = por %p3481_p7, %p3480_p6 }
  0x33   :  { %p3483_p9 = pnand %p3482_p8, %p3476_p5 }
  0x35   :  { %3486 = shalt.err (!%p3483_p9)
}
  0x36   :  { %30 = dma.hbm_to_vmem [thread:$0]  %s3835_s0, 896, %s28_s26, [#allocation3]  }
  0x37   :  { %s3487_s22 = scalar_lea.hbm %s3838_s3, 8192 }
  0x38   :  { %p3488_p10 = scmp.ne.s32.totalorder %s3838_s3, %s3487_s22  ;;  %p3491_p11 = scmp.lt.u32.totalorder %s3487_s22, %s3838_s3 }
  0x3a   :  { %p3493_p12 = pnand %p3491_p11, %p3488_p10 }
  0x3c   :  { %3496 = shalt.err (!%p3493_p12)
}
  0x3d   :  { %s3497_s29 = scalar_lea.vmem %s3688_s28, 8192  ;;  %p3502_p0 = scmp.lt.s32.totalorder %s3688_s28, %s3688_s28 }
  0x3e   :  { %p3498_p13 = scmp.ne.s32.totalorder %s3688_s28, %s3497_s29  ;;  %p3503_p1 = scmp.lt.s32.totalorder %s3497_s29, %s3497_s29 }
  0x40   :  { %p3504_p2 = por %p3503_p1, %p3502_p0 }
  0x42   :  { %p3505_p3 = pnand %p3504_p2, %p3498_p13 }
  0x44   :  { %3508 = shalt.err (!%p3505_p3)
}
  0x45   :  { %s3593_s0 = smov 128   ;;  %s3594_s26 = smov 8  }
  0x46   :  { %56 = dma.hbm_to_vmem [thread:$0]  %s3838_s3, 8192, %s3688_s28, [#allocation6], %s3593_s0, %s3593_s0, %s3594_s26  }
  0x47   :  { %s3595_s14 = smov [#allocation10]   ;;  %s3596_s16 = smov [#allocation11]  }
  0x48   :  { %s78_s15 = sshll.u32 %s3595_s14, 4  ;;  %s92_s17 = sshll.u32 %s3596_s16, 4  ;;  %s79_s15 = int_to_ptr.vmem [resolvable:$true] %s78_s15  ;;  %s3719_s17 = int_to_ptr.vmem [resolvable:$true] %s92_s17 }
  0x49   :  { %s3509_s19 = scalar_lea.hbm %s3842_s7, 1024 }
  0x4a   :  { %p3510_p4 = scmp.ne.s32.totalorder %s3842_s7, %s3509_s19  ;;  %p3513_p5 = scmp.lt.u32.totalorder %s3509_s19, %s3842_s7 }
  0x4c   :  { %p3515_p6 = pnand %p3513_p5, %p3510_p4 }
  0x4e   :  { %3518 = shalt.err (!%p3515_p6)
}
  0x4f   :  { %s3519_s3 = scalar_lea.vmem %s79_s15, 1024  ;;  %p3524_p8 = scmp.lt.s32.totalorder %s79_s15, %s79_s15 }
  0x50   :  { %p3520_p7 = scmp.ne.s32.totalorder %s79_s15, %s3519_s3  ;;  %p3525_p9 = scmp.lt.s32.totalorder %s3519_s3, %s3519_s3 }
  0x52   :  { %p3526_p10 = por %p3525_p9, %p3524_p8 }
  0x54   :  { %p3527_p11 = pnand %p3526_p10, %p3520_p7 }
  0x56   :  { %3530 = shalt.err (!%p3527_p11)
}
  0x57   :  { %84 = dma.hbm_to_vmem [thread:$0]  %s3842_s7, 1024, %s79_s15, [#allocation9], %s3589_s1, %s3589_s1, %s3590_s18  }
  0x58   :  { %s3531_s29 = scalar_lea.hbm %s3844_s9, 1024 }
  0x59   :  { %p3532_p12 = scmp.ne.s32.totalorder %s3844_s9, %s3531_s29  ;;  %p3535_p13 = scmp.lt.u32.totalorder %s3531_s29, %s3844_s9 }
  0x5b   :  { %p3537_p0 = pnand %p3535_p13, %p3532_p12 }
  0x5d   :  { %3540 = shalt.err (!%p3537_p0)
}
  0x5e   :  { %s3541_s14 = scalar_lea.vmem %s3719_s17, 1024  ;;  %p3546_p2 = scmp.lt.s32.totalorder %s3719_s17, %s3719_s17 }
  0x5f   :  { %p3542_p1 = scmp.ne.s32.totalorder %s3719_s17, %s3541_s14  ;;  %p3547_p3 = scmp.lt.s32.totalorder %s3541_s14, %s3541_s14 }
  0x61   :  { %p3548_p4 = por %p3547_p3, %p3546_p2 }
  0x63   :  { %p3549_p5 = pnand %p3548_p4, %p3542_p1 }
  0x65   :  { %3552 = shalt.err (!%p3549_p5)
}
  0x66   :  { %98 = dma.hbm_to_vmem [thread:$0]  %s3844_s9, 1024, %s3719_s17, [#allocation12], %s3589_s1, %s3589_s1, %s3590_s18  }
  0x67   :  { %3575 = dma.done.wait [#allocation3], 896  }
  0x68   :  { %3576 = vsyncadd [#allocation3], 4294966400 }
  0x69   :  { %3577 = dma.done.wait [#allocation6], 33280  }
  0x6a   :  { %3578 = vsyncadd [#allocation6], 4294934016 }
  0x6b   :  { %3579 = dma.done.wait [#allocation9], 3072  }
  0x6c   :  { %3580 = vsyncadd [#allocation9], 4294964224 }
  0x6d   :  { %3581 = dma.done.wait [#allocation12], 1024  }
  0x6e   :  { %3582 = vsyncadd [#allocation12], 4294966272  ;;  %v3597_v0 = vmov 0   ;;  %v2999_v1 = vld [vmem:[#allocation5 + $0x4] ss:$16 sps:$4 sm:$0xff]   ;;  %v126_v9 = vld [vmem:[#allocation2 + $0x30] sm:$0xff] }
  0x6f   :  { %1491 = vmatprep.mubr.bf16.mxu1 %v3597_v0  ;;  %v3001_v2 = vld [vmem:[#allocation5 + $0x604] ss:$16 sps:$4 sm:$0xff]   ;;  %1336 = vmatprep.subr.bf16.mxu0 %v2999_v1  ;;  %v3003_v3 = vld [vmem:[#allocation5] ss:$16 sps:$4 sm:$0xff]   ;;  %v3007_v6 = vld [vmem:[#allocation5 + $0x8] ss:$16 sps:$4 sm:$0xff]   ;;  %v3757_v10 = vpack.c.bf16 %v126_v9, %v126_v9 }
  0x70   :  { %v3004_v4 = vld [vmem:[#allocation5 + $0x600] ss:$16 sps:$4 sm:$0xff]   ;;  %1459 = vmatprep.subr.bf16.mxu1 %v3001_v2  ;;  %v3005_v5 = vld [vmem:[#allocation5 + $0x24] ss:$16 sps:$4 sm:$0xff]   ;;  %1337 = vmatpush1.bf16.msra.mxu0 %v3003_v3  ;;  %v3009_v7 = vld [vmem:[#allocation5 + $0xc] ss:$16 sps:$4 sm:$0xff]  }
  0x71   :  { %1460 = vmatpush1.bf16.msra.mxu1 %v3004_v4  ;;  %1338 = vmatprep.subr.bf16.mxu0 %v3005_v5  ;;  %v3010_v8 = vld [vmem:[#allocation5 + $0x20] ss:$16 sps:$4 sm:$0xff]   ;;  %vm1332_vm0 = vcmask 130048   ;;  %v3011_v11 = vld [vmem:[#allocation5 + $0x44] ss:$16 sps:$4 sm:$0xff]   ;;  %vm3599_vm1 = vmmov 0  }
  0x72   :  { %1500 = vmatprep.subr.bf16.mxu1 %v3009_v7  ;;  %v3013_v12 = vld [vmem:[#allocation5 + $0x28] ss:$16 sps:$4 sm:$0xff]   ;;  %v3015_v13 = vld [vmem:[#allocation5 + $0x2c] ss:$16 sps:$4 sm:$0xff]   ;;  %v3016_v14 = vld [vmem:[#allocation5 + $0x40] ss:$16 sps:$4 sm:$0xff]  }
  0x73   :  { %v3017_v15 = vld [vmem:[#allocation5 + $0x64] ss:$16 sps:$4 sm:$0xff]   ;;  %v3021_v16 = vld [vmem:[#allocation5 + $0x4c] ss:$16 sps:$4 sm:$0xff]   ;;  %v3022_v17 = vld [vmem:[#allocation5 + $0x60] ss:$16 sps:$4 sm:$0xff]  }
  0x74   :  { %1339 = vmatpush1.bf16.msra.mxu0 %v3010_v8  ;;  %2770 = vmatmul.mubr.msk.bf16.vlgmr.msra.gmra.mrb[0].mxu1 %vm1332_vm0, %v3757_v10  ;;  %v3019_v18 = vld [vmem:[#allocation5 + $0x48] ss:$16 sps:$4 sm:$0xff]   ;;  %v3023_v19 = vld [vmem:[#allocation5 + $0x84] ss:$16 sps:$4 sm:$0xff]   ;;  %v3027_v20 = vld [vmem:[#allocation5 + $0x6c] ss:$16 sps:$4 sm:$0xff]  }
  0x75   :  { %1501 = vmatpush1.bf16.msra.mxu1 %v3007_v6  ;;  %1340 = vmatprep.subr.bf16.mxu0 %v3011_v11  ;;  %v3025_v21 = vld [vmem:[#allocation5 + $0x68] ss:$16 sps:$4 sm:$0xff]   ;;  %v3028_v22 = vld [vmem:[#allocation5 + $0x80] ss:$16 sps:$4 sm:$0xff]   ;;  %v3029_v23 = vld [vmem:[#allocation5 + $0xa4] ss:$16 sps:$4 sm:$0xff]  }
  0x76   :  { %1502 = vmatprep.subr.bf16.mxu1 %v3015_v13  ;;  %v3033_v24 = vld [vmem:[#allocation5 + $0x8c] ss:$16 sps:$4 sm:$0xff]   ;;  %v3034_v25 = vld [vmem:[#allocation5 + $0xa0] ss:$16 sps:$4 sm:$0xff]   ;;  %v3031_v26 = vld [vmem:[#allocation5 + $0x88] ss:$16 sps:$4 sm:$0xff]  }
  0x77   :  { %v3035_v27 = vld [vmem:[#allocation5 + $0xc4] ss:$16 sps:$4 sm:$0xff]   ;;  %v3039_v28 = vld [vmem:[#allocation5 + $0xac] ss:$16 sps:$4 sm:$0xff]   ;;  %v3037_v29 = vld [vmem:[#allocation5 + $0xa8] ss:$16 sps:$4 sm:$0xff]  }
  0x78   :  { %1341 = vmatpush1.bf16.msra.mxu0 %v3016_v14  ;;  %v3040_v30 = vld [vmem:[#allocation5 + $0xc0] ss:$16 sps:$4 sm:$0xff]   ;;  %v3041_v31 = vld [vmem:[#allocation5 + $0xe4] ss:$16 sps:$4 sm:$0xff]   ;;  %v3045_v32 = vld [vmem:[#allocation5 + $0xcc] ss:$16 sps:$4 sm:$0xff]  }
  0x79   :  { %1503 = vmatpush1.bf16.msra.mxu1 %v3013_v12  ;;  %1342 = vmatprep.subr.bf16.mxu0 %v3017_v15  ;;  %v3046_v33 = vld [vmem:[#allocation5 + $0xe0] ss:$16 sps:$4 sm:$0xff]   ;;  %v3043_v34 = vld [vmem:[#allocation5 + $0xc8] ss:$16 sps:$4 sm:$0xff]   ;;  %v3047_v35 = vld [vmem:[#allocation5 + $0x104] ss:$16 sps:$4 sm:$0xff]  }
  0x7a   :  { %1504 = vmatprep.subr.bf16.mxu1 %v3021_v16  ;;  %v3051_v36 = vld [vmem:[#allocation5 + $0xec] ss:$16 sps:$4 sm:$0xff]   ;;  %v3049_v37 = vld [vmem:[#allocation5 + $0xe8] ss:$16 sps:$4 sm:$0xff]   ;;  %v3052_v38 = vld [vmem:[#allocation5 + $0x100] ss:$16 sps:$4 sm:$0xff]  }
  0x7b   :  { %v3053_v39 = vld [vmem:[#allocation5 + $0x124] ss:$16 sps:$4 sm:$0xff]   ;;  %v3057_v40 = vld [vmem:[#allocation5 + $0x10c] ss:$16 sps:$4 sm:$0xff]   ;;  %v3058_v41 = vld [vmem:[#allocation5 + $0x120] ss:$16 sps:$4 sm:$0xff]  }
  0x7c   :  { %1343 = vmatpush1.bf16.msra.mxu0 %v3022_v17  ;;  %v3055_v42 = vld [vmem:[#allocation5 + $0x108] ss:$16 sps:$4 sm:$0xff]   ;;  %v3059_v43 = vld [vmem:[#allocation5 + $0x144] ss:$16 sps:$4 sm:$0xff]   ;;  %v3063_v44 = vld [vmem:[#allocation5 + $0x12c] ss:$16 sps:$4 sm:$0xff]  }
  0x7d   :  { %1505 = vmatpush1.bf16.msra.mxu1 %v3019_v18  ;;  %1344 = vmatprep.subr.bf16.mxu0 %v3023_v19  ;;  %v3061_v45 = vld [vmem:[#allocation5 + $0x128] ss:$16 sps:$4 sm:$0xff]   ;;  %v3064_v46 = vld [vmem:[#allocation5 + $0x140] ss:$16 sps:$4 sm:$0xff]   ;;  %v3065_v47 = vld [vmem:[#allocation5 + $0x164] ss:$16 sps:$4 sm:$0xff]  }
  0x7e   :  { %1506 = vmatprep.subr.bf16.mxu1 %v3027_v20  ;;  %v3069_v48 = vld [vmem:[#allocation5 + $0x14c] ss:$16 sps:$4 sm:$0xff]   ;;  %v121_v49 = vld [vmem:[#allocation2 + $0x8] sm:$0xff]  ;;  %v3067_v52 = vld [vmem:[#allocation5 + $0x148] ss:$16 sps:$4 sm:$0xff]   ;;  %s3600_s19 = smov [#allocation13]  }
  0x7f   :  { %v3070_v50 = vld [vmem:[#allocation5 + $0x160] ss:$16 sps:$4 sm:$0xff]   ;;  %v128_v51 = vpack.c.bf16 %v121_v49, %v121_v49  ;;  %v3071_v53 = vld [vmem:[#allocation5 + $0x184] ss:$16 sps:$4 sm:$0xff]   ;;  %v3075_v54 = vld [vmem:[#allocation5 + $0x16c] ss:$16 sps:$4 sm:$0xff]  }
  0x80   :  { %1345 = vmatpush1.bf16.msra.mxu0 %v3028_v22  ;;  %v3073_v55 = vld [vmem:[#allocation5 + $0x168] ss:$16 sps:$4 sm:$0xff]   ;;  %v3076_v56 = vld [vmem:[#allocation5 + $0x180] ss:$16 sps:$4 sm:$0xff]   ;;  %v3077_v57 = vld [vmem:[#allocation5 + $0x1a4] ss:$16 sps:$4 sm:$0xff]  }
  0x81   :  { %1507 = vmatpush1.bf16.msra.mxu1 %v3025_v21  ;;  %1346 = vmatprep.subr.bf16.mxu0 %v3029_v23  ;;  %v3081_v58 = vld [vmem:[#allocation5 + $0x18c] ss:$16 sps:$4 sm:$0xff]   ;;  %v3079_v59 = vld [vmem:[#allocation5 + $0x188] ss:$16 sps:$4 sm:$0xff]   ;;  %v3082_v60 = vld [vmem:[#allocation5 + $0x1a0] ss:$16 sps:$4 sm:$0xff]  }
  0x82   :  { %1508 = vmatprep.subr.bf16.mxu1 %v3033_v24  ;;  %1368 = vmatprep.mubr.bf16.mxu0 %v128_v51  ;;  %v3083_v61 = vld [vmem:[#allocation5 + $0x1c4] ss:$16 sps:$4 sm:$0xff]   ;;  %v3087_v62 = vld [vmem:[#allocation5 + $0x1ac] ss:$16 sps:$4 sm:$0xff]   ;;  %v3085_v63 = vld [vmem:[#allocation5 + $0x1a8] ss:$16 sps:$4 sm:$0xff]  }
  0x83   :  { %1532 = vmatprep.mubr.bf16.mxu1 %v128_v51  ;;  %v3088_v1 = vld [vmem:[#allocation5 + $0x1c0] ss:$16 sps:$4 sm:$0xff]   ;;  %v3089_v2 = vld [vmem:[#allocation5 + $0x1e4] ss:$16 sps:$4 sm:$0xff]   ;;  %v3093_v3 = vld [vmem:[#allocation5 + $0x1cc] ss:$16 sps:$4 sm:$0xff]  }
  0x84   :  { %1347 = vmatpush1.bf16.msra.mxu0 %v3034_v25  ;;  %v3091_v4 = vld [vmem:[#allocation5 + $0x1c8] ss:$16 sps:$4 sm:$0xff]   ;;  %v3094_v5 = vld [vmem:[#allocation5 + $0x1e0] ss:$16 sps:$4 sm:$0xff]   ;;  %v3097_v7 = vld [vmem:[#allocation5 + $0x204] ss:$16 sps:$4 sm:$0xff]  }
  0x85   :  { %1509 = vmatpush1.bf16.msra.mxu1 %v3031_v26  ;;  %1348 = vmatprep.subr.bf16.mxu0 %v3035_v27  ;;  %v120_v6 = vld [vmem:[#allocation2] sm:$0xff]  ;;  %v3095_v11 = vld [vmem:[#allocation5 + $0x200] ss:$16 sps:$4 sm:$0xff]   ;;  %v3103_v13 = vld [vmem:[#allocation5 + $0x224] ss:$16 sps:$4 sm:$0xff]   ;;  %s2562_s20 = sshll.u32 %s3600_s19, 4  ;;  %s2563_s20 = int_to_ptr.vmem [resolvable:$true] %s2562_s20 }
  0x86   :  { %1510 = vmatprep.subr.bf16.mxu1 %v3039_v28  ;;  %v3100_v8 = vld [vmem:[#allocation5 + $0x1ec] ss:$16 sps:$4 sm:$0xff]   ;;  %v127_v9 = vpack.c.bf16 %v120_v6, %v120_v6  ;;  %v3098_v12 = vld [vmem:[#allocation5 + $0x1e8] ss:$16 sps:$4 sm:$0xff]   ;;  %v3101_v15 = vld [vmem:[#allocation5 + $0x220] ss:$16 sps:$4 sm:$0xff]   ;;  %p3558_p7 = scmp.lt.s32.totalorder %s2563_s20, %s2563_s20 }
  0x87   :  { %v3106_v14 = vld [vmem:[#allocation5 + $0x20c] ss:$16 sps:$4 sm:$0xff]   ;;  %v3104_v16 = vld [vmem:[#allocation5 + $0x208] ss:$16 sps:$4 sm:$0xff]   ;;  %v3109_v17 = vld [vmem:[#allocation5 + $0x244] ss:$16 sps:$4 sm:$0xff]  }
  0x88   :  { %1349 = vmatpush1.bf16.msra.mxu0 %v3040_v30  ;;  %v3112_v18 = vld [vmem:[#allocation5 + $0x22c] ss:$16 sps:$4 sm:$0xff]   ;;  %v3107_v19 = vld [vmem:[#allocation5 + $0x240] ss:$16 sps:$4 sm:$0xff]   ;;  %v3110_v20 = vld [vmem:[#allocation5 + $0x228] ss:$16 sps:$4 sm:$0xff]  }
  0x89   :  { %1511 = vmatpush1.bf16.msra.mxu1 %v3037_v29  ;;  %1350 = vmatprep.subr.bf16.mxu0 %v3041_v31  ;;  %v3115_v21 = vld [vmem:[#allocation5 + $0x264] ss:$16 sps:$4 sm:$0xff]   ;;  %v3118_v22 = vld [vmem:[#allocation5 + $0x24c] ss:$16 sps:$4 sm:$0xff]   ;;  %v3113_v23 = vld [vmem:[#allocation5 + $0x260] ss:$16 sps:$4 sm:$0xff]  }
  0x8a   :  { %1512 = vmatprep.subr.bf16.mxu1 %v3045_v32  ;;  %v3116_v24 = vld [vmem:[#allocation5 + $0x248] ss:$16 sps:$4 sm:$0xff]   ;;  %v3121_v25 = vld [vmem:[#allocation5 + $0x284] ss:$16 sps:$4 sm:$0xff]   ;;  %v3124_v26 = vld [vmem:[#allocation5 + $0x26c] ss:$16 sps:$4 sm:$0xff]  }
  0x8b   :  { %v3119_v27 = vld [vmem:[#allocation5 + $0x280] ss:$16 sps:$4 sm:$0xff]   ;;  %v3122_v28 = vld [vmem:[#allocation5 + $0x268] ss:$16 sps:$4 sm:$0xff]   ;;  %v3127_v29 = vld [vmem:[#allocation5 + $0x2a4] ss:$16 sps:$4 sm:$0xff]  }
  0x8c   :  { %1351 = vmatpush1.bf16.msra.mxu0 %v3046_v33  ;;  %v3130_v30 = vld [vmem:[#allocation5 + $0x28c] ss:$16 sps:$4 sm:$0xff]   ;;  %v3125_v31 = vld [vmem:[#allocation5 + $0x2a0] ss:$16 sps:$4 sm:$0xff]   ;;  %v3128_v32 = vld [vmem:[#allocation5 + $0x288] ss:$16 sps:$4 sm:$0xff]  }
  0x8d   :  { %1513 = vmatpush1.bf16.msra.mxu1 %v3043_v34  ;;  %1352 = vmatprep.subr.bf16.mxu0 %v3047_v35  ;;  %v3133_v33 = vld [vmem:[#allocation5 + $0x2c4] ss:$16 sps:$4 sm:$0xff]   ;;  %v3136_v34 = vld [vmem:[#allocation5 + $0x2ac] ss:$16 sps:$4 sm:$0xff]   ;;  %v3149_v49 = vld [vmem:[#allocation5 + $0x320] ss:$16 sps:$4 sm:$0xff]  }
  0x8e   :  { %1514 = vmatprep.subr.bf16.mxu1 %v3051_v36  ;;  %v123_v35 = vld [vmem:[#allocation2 + $0x18] sm:$0xff] }
  0x8f   :  { %v130_v36 = vpack.c.bf16 %v123_v35, %v123_v35  ;;  %v3157_v51 = vld [vmem:[#allocation5 + $0x344] ss:$16 sps:$4 sm:$0xff]   ;;  %v3179_v6 = vld [vmem:[#allocation5 + $0x3c0] ss:$16 sps:$4 sm:$0xff]  }
  0x90   :  { %1353 = vmatpush1.bf16.msra.mxu0 %v3052_v38  ;;  %v3134_v38 = vld [vmem:[#allocation5 + $0x2a8] ss:$16 sps:$4 sm:$0xff]   ;;  %v3215_v35 = vld [vmem:[#allocation5 + $0x480] ss:$16 sps:$4 sm:$0xff]  }
  0x91   :  { %1515 = vmatpush1.bf16.msra.mxu1 %v3049_v37  ;;  %1354 = vmatprep.subr.bf16.mxu0 %v3053_v39  ;;  %v3131_v37 = vld [vmem:[#allocation5 + $0x2c0] ss:$16 sps:$4 sm:$0xff]   ;;  %v3139_v39 = vld [vmem:[#allocation5 + $0x2e4] ss:$16 sps:$4 sm:$0xff]  }
  0x92   :  { %1516 = vmatprep.subr.bf16.mxu1 %v3057_v40  ;;  %v3142_v40 = vld [vmem:[#allocation5 + $0x2cc] ss:$16 sps:$4 sm:$0xff]  }
  0x94   :  { %1355 = vmatpush1.bf16.msra.mxu0 %v3058_v41  ;;  %v3137_v41 = vld [vmem:[#allocation5 + $0x2e0] ss:$16 sps:$4 sm:$0xff]  }
  0x95   :  { %1517 = vmatpush1.bf16.msra.mxu1 %v3055_v42  ;;  %1356 = vmatprep.subr.bf16.mxu0 %v3059_v43  ;;  %v3140_v42 = vld [vmem:[#allocation5 + $0x2c8] ss:$16 sps:$4 sm:$0xff]   ;;  %v3145_v43 = vld [vmem:[#allocation5 + $0x304] ss:$16 sps:$4 sm:$0xff]  }
  0x96   :  { %1518 = vmatprep.subr.bf16.mxu1 %v3063_v44  ;;  %v3148_v44 = vld [vmem:[#allocation5 + $0x2ec] ss:$16 sps:$4 sm:$0xff]  }
  0x98   :  { %1357 = vmatpush1.bf16.msra.mxu0 %v3064_v46  ;;  %v3146_v46 = vld [vmem:[#allocation5 + $0x2e8] ss:$16 sps:$4 sm:$0xff]  }
  0x99   :  { %1519 = vmatpush1.bf16.msra.mxu1 %v3061_v45  ;;  %1358 = vmatprep.subr.bf16.mxu0 %v3065_v47  ;;  %v3143_v45 = vld [vmem:[#allocation5 + $0x300] ss:$16 sps:$4 sm:$0xff]   ;;  %v3151_v47 = vld [vmem:[#allocation5 + $0x324] ss:$16 sps:$4 sm:$0xff]  }
  0x9a   :  { %1520 = vmatprep.subr.bf16.mxu1 %v3069_v48  ;;  %v3154_v48 = vld [vmem:[#allocation5 + $0x30c] ss:$16 sps:$4 sm:$0xff]  }
  0x9c   :  { %1359 = vmatpush1.bf16.msra.mxu0 %v3070_v50  ;;  %v3152_v50 = vld [vmem:[#allocation5 + $0x308] ss:$16 sps:$4 sm:$0xff]  }
  0x9d   :  { %1521 = vmatpush1.bf16.msra.mxu1 %v3067_v52  ;;  %1360 = vmatprep.subr.bf16.mxu0 %v3071_v53  ;;  %v3160_v52 = vld [vmem:[#allocation5 + $0x32c] ss:$16 sps:$4 sm:$0xff]   ;;  %v3155_v53 = vld [vmem:[#allocation5 + $0x340] ss:$16 sps:$4 sm:$0xff]  }
  0x9e   :  { %1522 = vmatprep.subr.bf16.mxu1 %v3075_v54  ;;  %v3158_v54 = vld [vmem:[#allocation5 + $0x328] ss:$16 sps:$4 sm:$0xff]  }
  0xa0   :  { %1361 = vmatpush1.bf16.msra.mxu0 %v3076_v56  ;;  %v3166_v56 = vld [vmem:[#allocation5 + $0x34c] ss:$16 sps:$4 sm:$0xff]  }
  0xa1   :  { %1523 = vmatpush1.bf16.msra.mxu1 %v3073_v55  ;;  %1362 = vmatprep.subr.bf16.mxu0 %v3077_v57  ;;  %v3163_v55 = vld [vmem:[#allocation5 + $0x364] ss:$16 sps:$4 sm:$0xff]   ;;  %v3161_v57 = vld [vmem:[#allocation5 + $0x360] ss:$16 sps:$4 sm:$0xff]  }
  0xa2   :  { %1524 = vmatprep.subr.bf16.mxu1 %v3081_v58  ;;  %v3164_v58 = vld [vmem:[#allocation5 + $0x348] ss:$16 sps:$4 sm:$0xff]  }
  0xa4   :  { %1363 = vmatpush1.bf16.msra.mxu0 %v3082_v60  ;;  %v3172_v60 = vld [vmem:[#allocation5 + $0x36c] ss:$16 sps:$4 sm:$0xff]  }
  0xa5   :  { %1525 = vmatpush1.bf16.msra.mxu1 %v3079_v59  ;;  %1364 = vmatprep.subr.bf16.mxu0 %v3083_v61  ;;  %v3169_v59 = vld [vmem:[#allocation5 + $0x384] ss:$16 sps:$4 sm:$0xff]   ;;  %v3167_v61 = vld [vmem:[#allocation5 + $0x380] ss:$16 sps:$4 sm:$0xff]  }
  0xa6   :  { %1526 = vmatprep.subr.bf16.mxu1 %v3087_v62  ;;  %v3170_v62 = vld [vmem:[#allocation5 + $0x368] ss:$16 sps:$4 sm:$0xff]  }
  0xa8   :  { %1365 = vmatpush1.bf16.msra.mxu0 %v3088_v1  ;;  %v3178_v1 = vld [vmem:[#allocation5 + $0x38c] ss:$16 sps:$4 sm:$0xff]  }
  0xa9   :  { %1527 = vmatpush1.bf16.msra.mxu1 %v3085_v63  ;;  %1366 = vmatprep.subr.bf16.mxu0 %v3089_v2  ;;  %v3175_v63 = vld [vmem:[#allocation5 + $0x3a4] ss:$16 sps:$4 sm:$0xff]   ;;  %v3173_v2 = vld [vmem:[#allocation5 + $0x3a0] ss:$16 sps:$4 sm:$0xff]  }
  0xaa   :  { %1528 = vmatprep.subr.bf16.mxu1 %v3093_v3  ;;  %v3176_v3 = vld [vmem:[#allocation5 + $0x388] ss:$16 sps:$4 sm:$0xff]  }
  0xac   :  { %1367 = vmatpush1.bf16.msra.mxu0 %v3094_v5  ;;  %v3184_v5 = vld [vmem:[#allocation5 + $0x3ac] ss:$16 sps:$4 sm:$0xff]  }
  0xad   :  { %1529 = vmatpush1.bf16.msra.mxu1 %v3091_v4  ;;  %1377 = vmatprep.subr.bf16.mxu0 %v3097_v7  ;;  %v3181_v4 = vld [vmem:[#allocation5 + $0x3c4] ss:$16 sps:$4 sm:$0xff]   ;;  %v3182_v7 = vld [vmem:[#allocation5 + $0x3a8] ss:$16 sps:$4 sm:$0xff]  }
  0xae   :  { %1530 = vmatprep.subr.bf16.mxu1 %v3100_v8  ;;  %v3187_v8 = vld [vmem:[#allocation5 + $0x3e4] ss:$16 sps:$4 sm:$0xff]  }
  0xaf   :  { %1369 = vmatmul.mubr.bf16.vlgmr.msra.gmra.mrb[0].mxu0 %v127_v9 }
  0xb0   :  { %1378 = vmatpush1.bf16.msra.mxu0 %v3095_v11  ;;  %1409 = vmatprep.mubr.bf16.mxu0 %v130_v36  ;;  %v3185_v11 = vld [vmem:[#allocation5 + $0x3e0] ss:$16 sps:$4 sm:$0xff]  }
  0xb1   :  { %1531 = vmatpush1.bf16.msra.mxu1 %v3098_v12  ;;  %1379 = vmatprep.subr.bf16.mxu0 %v3103_v13  ;;  %v122_v12 = vld [vmem:[#allocation2 + $0x10] sm:$0xff] }
  0xb2   :  { %1541 = vmatprep.subr.bf16.mxu1 %v3106_v14  ;;  %v3188_v13 = vld [vmem:[#allocation5 + $0x3c8] ss:$16 sps:$4 sm:$0xff]   ;;  %v3193_v14 = vld [vmem:[#allocation5 + $0x404] ss:$16 sps:$4 sm:$0xff]  }
  0xb4   :  { %1380 = vmatpush1.bf16.msra.mxu0 %v3101_v15  ;;  %1533 = vmatmul.mubr.bf16.vlgmr.msra.gmra.mrb[4].mxu1 %v127_v9  ;;  %v3190_v9 = vld [vmem:[#allocation5 + $0x3cc] ss:$16 sps:$4 sm:$0xff]  }
  0xb5   :  { %1542 = vmatpush1.bf16.msra.mxu1 %v3104_v16  ;;  %1381 = vmatprep.subr.bf16.mxu0 %v3109_v17  ;;  %v3196_v15 = vld [vmem:[#allocation5 + $0x3ec] ss:$16 sps:$4 sm:$0xff]   ;;  %v129_v16 = vpack.c.bf16 %v122_v12, %v122_v12  ;;  %v3191_v17 = vld [vmem:[#allocation5 + $0x400] ss:$16 sps:$4 sm:$0xff]  }
  0xb6   :  { %1543 = vmatprep.subr.bf16.mxu1 %v3112_v18  ;;  %1573 = vmatprep.mubr.bf16.mxu1 %v130_v36  ;;  %v3194_v18 = vld [vmem:[#allocation5 + $0x3e8] ss:$16 sps:$4 sm:$0xff]   ;;  %v3280_v12 = vld [vmem:[#allocation5 + $0x5ac] ss:$16 sps:$4 sm:$0xff]  }
  0xb7   :  { %v3218_v36 = vld [vmem:[#allocation5 + $0x468] ss:$16 sps:$4 sm:$0xff]  }
  0xb8   :  { %1382 = vmatpush1.bf16.msra.mxu0 %v3107_v19  ;;  %v3199_v19 = vld [vmem:[#allocation5 + $0x424] ss:$16 sps:$4 sm:$0xff]  }
  0xb9   :  { %1544 = vmatpush1.bf16.msra.mxu1 %v3110_v20  ;;  %1383 = vmatprep.subr.bf16.mxu0 %v3115_v21  ;;  %v125_v20 = vld [vmem:[#allocation2 + $0x28] sm:$0xff]  ;;  %v3202_v21 = vld [vmem:[#allocation5 + $0x40c] ss:$16 sps:$4 sm:$0xff]  }
  0xba   :  { %1545 = vmatprep.subr.bf16.mxu1 %v3118_v22  ;;  %v132_v22 = vpack.c.bf16 %v125_v20, %v125_v20  ;;  %v3295_v20 = vld [vmem:[#allocation7 + $0x4] ss:$8 sps:$4 sm:$0xff]  }
  0xbc   :  { %1384 = vmatpush1.bf16.msra.mxu0 %v3113_v23  ;;  %v3197_v23 = vld [vmem:[#allocation5 + $0x420] ss:$16 sps:$4 sm:$0xff]  }
  0xbd   :  { %1546 = vmatpush1.bf16.msra.mxu1 %v3116_v24  ;;  %1385 = vmatprep.subr.bf16.mxu0 %v3121_v25  ;;  %v3200_v24 = vld [vmem:[#allocation5 + $0x408] ss:$16 sps:$4 sm:$0xff]   ;;  %v3205_v25 = vld [vmem:[#allocation5 + $0x444] ss:$16 sps:$4 sm:$0xff]  }
  0xbe   :  { %1547 = vmatprep.subr.bf16.mxu1 %v3124_v26  ;;  %v3208_v26 = vld [vmem:[#allocation5 + $0x42c] ss:$16 sps:$4 sm:$0xff]  }
  0xc0   :  { %1386 = vmatpush1.bf16.msra.mxu0 %v3119_v27  ;;  %v3203_v27 = vld [vmem:[#allocation5 + $0x440] ss:$16 sps:$4 sm:$0xff]  }
  0xc1   :  { %1548 = vmatpush1.bf16.msra.mxu1 %v3122_v28  ;;  %1387 = vmatprep.subr.bf16.mxu0 %v3127_v29  ;;  %v3206_v28 = vld [vmem:[#allocation5 + $0x428] ss:$16 sps:$4 sm:$0xff]   ;;  %v3211_v29 = vld [vmem:[#allocation5 + $0x464] ss:$16 sps:$4 sm:$0xff]  }
  0xc2   :  { %1549 = vmatprep.subr.bf16.mxu1 %v3130_v30  ;;  %v3214_v30 = vld [vmem:[#allocation5 + $0x44c] ss:$16 sps:$4 sm:$0xff]  }
  0xc4   :  { %1388 = vmatpush1.bf16.msra.mxu0 %v3125_v31  ;;  %v3209_v31 = vld [vmem:[#allocation5 + $0x460] ss:$16 sps:$4 sm:$0xff]  }
  0xc5   :  { %1550 = vmatpush1.bf16.msra.mxu1 %v3128_v32  ;;  %1389 = vmatprep.subr.bf16.mxu0 %v3133_v33  ;;  %v3212_v32 = vld [vmem:[#allocation5 + $0x448] ss:$16 sps:$4 sm:$0xff]   ;;  %v3217_v33 = vld [vmem:[#allocation5 + $0x484] ss:$16 sps:$4 sm:$0xff]  }
  0xc6   :  { %1551 = vmatprep.subr.bf16.mxu1 %v3136_v34  ;;  %v3220_v34 = vld [vmem:[#allocation5 + $0x46c] ss:$16 sps:$4 sm:$0xff]  }
  0xc8   :  { %1390 = vmatpush1.bf16.msra.mxu0 %v3131_v37  ;;  %v3223_v37 = vld [vmem:[#allocation5 + $0x4a4] ss:$16 sps:$4 sm:$0xff]  }
  0xc9   :  { %1552 = vmatpush1.bf16.msra.mxu1 %v3134_v38  ;;  %1391 = vmatprep.subr.bf16.mxu0 %v3139_v39  ;;  %v3226_v38 = vld [vmem:[#allocation5 + $0x48c] ss:$16 sps:$4 sm:$0xff]   ;;  %v3221_v39 = vld [vmem:[#allocation5 + $0x4a0] ss:$16 sps:$4 sm:$0xff]  }
  0xca   :  { %1553 = vmatprep.subr.bf16.mxu1 %v3142_v40  ;;  %v3224_v40 = vld [vmem:[#allocation5 + $0x488] ss:$16 sps:$4 sm:$0xff]  }
  0xcc   :  { %1392 = vmatpush1.bf16.msra.mxu0 %v3137_v41  ;;  %v3229_v41 = vld [vmem:[#allocation5 + $0x4c4] ss:$16 sps:$4 sm:$0xff]  }
  0xcd   :  { %1554 = vmatpush1.bf16.msra.mxu1 %v3140_v42  ;;  %1393 = vmatprep.subr.bf16.mxu0 %v3145_v43  ;;  %v3232_v42 = vld [vmem:[#allocation5 + $0x4ac] ss:$16 sps:$4 sm:$0xff]   ;;  %v3227_v43 = vld [vmem:[#allocation5 + $0x4c0] ss:$16 sps:$4 sm:$0xff]  }
  0xce   :  { %1555 = vmatprep.subr.bf16.mxu1 %v3148_v44  ;;  %v3230_v44 = vld [vmem:[#allocation5 + $0x4a8] ss:$16 sps:$4 sm:$0xff]  }
  0xd0   :  { %1394 = vmatpush1.bf16.msra.mxu0 %v3143_v45  ;;  %v3235_v45 = vld [vmem:[#allocation5 + $0x4e4] ss:$16 sps:$4 sm:$0xff]  }
  0xd1   :  { %1556 = vmatpush1.bf16.msra.mxu1 %v3146_v46  ;;  %1395 = vmatprep.subr.bf16.mxu0 %v3151_v47  ;;  %v3238_v46 = vld [vmem:[#allocation5 + $0x4cc] ss:$16 sps:$4 sm:$0xff]   ;;  %v3233_v47 = vld [vmem:[#allocation5 + $0x4e0] ss:$16 sps:$4 sm:$0xff]  }
  0xd2   :  { %1557 = vmatprep.subr.bf16.mxu1 %v3154_v48  ;;  %v3236_v48 = vld [vmem:[#allocation5 + $0x4c8] ss:$16 sps:$4 sm:$0xff]  }
  0xd4   :  { %1396 = vmatpush1.bf16.msra.mxu0 %v3149_v49  ;;  %v3241_v49 = vld [vmem:[#allocation5 + $0x504] ss:$16 sps:$4 sm:$0xff]  }
  0xd5   :  { %1558 = vmatpush1.bf16.msra.mxu1 %v3152_v50  ;;  %1397 = vmatprep.subr.bf16.mxu0 %v3157_v51  ;;  %v3244_v50 = vld [vmem:[#allocation5 + $0x4ec] ss:$16 sps:$4 sm:$0xff]   ;;  %v3239_v51 = vld [vmem:[#allocation5 + $0x500] ss:$16 sps:$4 sm:$0xff]  }
  0xd6   :  { %1559 = vmatprep.subr.bf16.mxu1 %v3160_v52  ;;  %v3242_v52 = vld [vmem:[#allocation5 + $0x4e8] ss:$16 sps:$4 sm:$0xff]  }
  0xd8   :  { %1398 = vmatpush1.bf16.msra.mxu0 %v3155_v53  ;;  %v3247_v53 = vld [vmem:[#allocation5 + $0x524] ss:$16 sps:$4 sm:$0xff]  }
  0xd9   :  { %1560 = vmatpush1.bf16.msra.mxu1 %v3158_v54  ;;  %1399 = vmatprep.subr.bf16.mxu0 %v3163_v55  ;;  %v3250_v54 = vld [vmem:[#allocation5 + $0x50c] ss:$16 sps:$4 sm:$0xff]   ;;  %v3245_v55 = vld [vmem:[#allocation5 + $0x520] ss:$16 sps:$4 sm:$0xff]  }
  0xda   :  { %1561 = vmatprep.subr.bf16.mxu1 %v3166_v56  ;;  %v3248_v56 = vld [vmem:[#allocation5 + $0x508] ss:$16 sps:$4 sm:$0xff]  }
  0xdc   :  { %1400 = vmatpush1.bf16.msra.mxu0 %v3161_v57  ;;  %v3253_v57 = vld [vmem:[#allocation5 + $0x544] ss:$16 sps:$4 sm:$0xff]  }
  0xdd   :  { %1562 = vmatpush1.bf16.msra.mxu1 %v3164_v58  ;;  %1401 = vmatprep.subr.bf16.mxu0 %v3169_v59  ;;  %v3256_v58 = vld [vmem:[#allocation5 + $0x52c] ss:$16 sps:$4 sm:$0xff]   ;;  %v3251_v59 = vld [vmem:[#allocation5 + $0x540] ss:$16 sps:$4 sm:$0xff]  }
  0xde   :  { %1563 = vmatprep.subr.bf16.mxu1 %v3172_v60  ;;  %v3254_v60 = vld [vmem:[#allocation5 + $0x528] ss:$16 sps:$4 sm:$0xff]  }
  0xe0   :  { %1402 = vmatpush1.bf16.msra.mxu0 %v3167_v61  ;;  %v3259_v61 = vld [vmem:[#allocation5 + $0x564] ss:$16 sps:$4 sm:$0xff]  }
  0xe1   :  { %1564 = vmatpush1.bf16.msra.mxu1 %v3170_v62  ;;  %1403 = vmatprep.subr.bf16.mxu0 %v3175_v63  ;;  %v3262_v62 = vld [vmem:[#allocation5 + $0x54c] ss:$16 sps:$4 sm:$0xff]   ;;  %v3257_v63 = vld [vmem:[#allocation5 + $0x560] ss:$16 sps:$4 sm:$0xff]  }
  0xe2   :  { %1565 = vmatprep.subr.bf16.mxu1 %v3178_v1  ;;  %v3260_v1 = vld [vmem:[#allocation5 + $0x548] ss:$16 sps:$4 sm:$0xff]  }
  0xe4   :  { %1404 = vmatpush1.bf16.msra.mxu0 %v3173_v2  ;;  %v3265_v2 = vld [vmem:[#allocation5 + $0x584] ss:$16 sps:$4 sm:$0xff]  }
  0xe5   :  { %1566 = vmatpush1.bf16.msra.mxu1 %v3176_v3  ;;  %1405 = vmatprep.subr.bf16.mxu0 %v3181_v4  ;;  %v3268_v3 = vld [vmem:[#allocation5 + $0x56c] ss:$16 sps:$4 sm:$0xff]   ;;  %v3263_v4 = vld [vmem:[#allocation5 + $0x580] ss:$16 sps:$4 sm:$0xff]  }
  0xe6   :  { %1567 = vmatprep.subr.bf16.mxu1 %v3184_v5  ;;  %v3266_v5 = vld [vmem:[#allocation5 + $0x568] ss:$16 sps:$4 sm:$0xff]  }
  0xe8   :  { %1406 = vmatpush1.bf16.msra.mxu0 %v3179_v6  ;;  %v3271_v6 = vld [vmem:[#allocation5 + $0x5a4] ss:$16 sps:$4 sm:$0xff]  }
  0xe9   :  { %1568 = vmatpush1.bf16.msra.mxu1 %v3182_v7  ;;  %1407 = vmatprep.subr.bf16.mxu0 %v3187_v8  ;;  %v3274_v7 = vld [vmem:[#allocation5 + $0x58c] ss:$16 sps:$4 sm:$0xff]   ;;  %v3269_v8 = vld [vmem:[#allocation5 + $0x5a0] ss:$16 sps:$4 sm:$0xff]  }
  0xea   :  { %1569 = vmatprep.subr.bf16.mxu1 %v3190_v9  ;;  %v3272_v9 = vld [vmem:[#allocation5 + $0x588] ss:$16 sps:$4 sm:$0xff]  }
  0xec   :  { %1408 = vmatpush1.bf16.msra.mxu0 %v3185_v11  ;;  %v3277_v11 = vld [vmem:[#allocation5 + $0x5c4] ss:$16 sps:$4 sm:$0xff]  }
  0xed   :  { %1570 = vmatpush1.bf16.msra.mxu1 %v3188_v13  ;;  %1418 = vmatprep.subr.bf16.mxu0 %v3193_v14  ;;  %v3275_v13 = vld [vmem:[#allocation5 + $0x5c0] ss:$16 sps:$4 sm:$0xff]   ;;  %v3278_v14 = vld [vmem:[#allocation5 + $0x5a8] ss:$16 sps:$4 sm:$0xff]  }
  0xee   :  { %1571 = vmatprep.subr.bf16.mxu1 %v3196_v15  ;;  %v3283_v15 = vld [vmem:[#allocation5 + $0x5e4] ss:$16 sps:$4 sm:$0xff]  }
  0xef   :  { %1410 = vmatmul.mubr.bf16.vlgmr.msra.gmra.mrb[0].mxu0 %v129_v16 }
  0xf0   :  { %1419 = vmatpush1.bf16.msra.mxu0 %v3191_v17  ;;  %1450 = vmatprep.mubr.bf16.mxu0 %v132_v22  ;;  %v3281_v17 = vld [vmem:[#allocation5 + $0x5e0] ss:$16 sps:$4 sm:$0xff]  }
  0xf1   :  { %1572 = vmatpush1.bf16.msra.mxu1 %v3194_v18  ;;  %1420 = vmatprep.subr.bf16.mxu0 %v3199_v19  ;;  %v124_v18 = vld [vmem:[#allocation2 + $0x20] sm:$0xff] }
  0xf2   :  { %1582 = vmatprep.subr.bf16.mxu1 %v3202_v21  ;;  %v3284_v19 = vld [vmem:[#allocation5 + $0x5c8] ss:$16 sps:$4 sm:$0xff]   ;;  %v3289_v21 = vld [vmem:[#allocation5 + $0x5ec] ss:$16 sps:$4 sm:$0xff]  }
  0xf4   :  { %1421 = vmatpush1.bf16.msra.mxu0 %v3197_v23  ;;  %1574 = vmatmul.mubr.bf16.vlgmr.msra.gmra.mrb[4].mxu1 %v129_v16  ;;  %v3286_v16 = vld [vmem:[#allocation5 + $0x5cc] ss:$16 sps:$4 sm:$0xff]   ;;  %v3293_v23 = vld [vmem:[#allocation7] ss:$8 sps:$4 sm:$0xff]  }
  0xf5   :  { %1583 = vmatpush1.bf16.msra.mxu1 %v3200_v24  ;;  %1422 = vmatprep.subr.bf16.mxu0 %v3205_v25  ;;  %v3287_v24 = vld [vmem:[#allocation5 + $0x5e8] ss:$16 sps:$4 sm:$0xff]   ;;  %v3298_v25 = vld [vmem:[#allocation7 + $0x14] ss:$8 sps:$4 sm:$0xff]  }
  0xf6   :  { %1584 = vmatprep.subr.bf16.mxu1 %v3208_v26  ;;  %1614 = vmatprep.mubr.bf16.mxu1 %v132_v22  ;;  %v131_v22 = vpack.c.bf16 %v124_v18, %v124_v18  ;;  %v3292_v26 = vld [vmem:[#allocation5 + $0x60c] ss:$16 sps:$4 sm:$0xff]  }
  0xf8   :  { %1423 = vmatpush1.bf16.msra.mxu0 %v3203_v27  ;;  %v3296_v27 = vld [vmem:[#allocation7 + $0x10] ss:$8 sps:$4 sm:$0xff]  }
  0xf9   :  { %1585 = vmatpush1.bf16.msra.mxu1 %v3206_v28  ;;  %1424 = vmatprep.subr.bf16.mxu0 %v3211_v29  ;;  %v3290_v28 = vld [vmem:[#allocation5 + $0x608] ss:$16 sps:$4 sm:$0xff]   ;;  %v3301_v29 = vld [vmem:[#allocation7 + $0x24] ss:$8 sps:$4 sm:$0xff]  }
  0xfa   :  { %1586 = vmatprep.subr.bf16.mxu1 %v3214_v30  ;;  %v3299_v30 = vld [vmem:[#allocation7 + $0x20] ss:$8 sps:$4 sm:$0xff]  }
  0xfc   :  { %1425 = vmatpush1.bf16.msra.mxu0 %v3209_v31  ;;  %v3304_v31 = vld [vmem:[#allocation7 + $0x34] ss:$8 sps:$4 sm:$0xff]  }
  0xfd   :  { %1587 = vmatpush1.bf16.msra.mxu1 %v3212_v32  ;;  %1426 = vmatprep.subr.bf16.mxu0 %v3217_v33  ;;  %v3302_v32 = vld [vmem:[#allocation7 + $0x30] ss:$8 sps:$4 sm:$0xff]   ;;  %v3307_v33 = vld [vmem:[#allocation7 + $0x44] ss:$8 sps:$4 sm:$0xff]  }
  0xfe   :  { %1588 = vmatprep.subr.bf16.mxu1 %v3220_v34  ;;  %v3305_v34 = vld [vmem:[#allocation7 + $0x40] ss:$8 sps:$4 sm:$0xff]  }
 0x100   :  { %1427 = vmatpush1.bf16.msra.mxu0 %v3215_v35  ;;  %v3310_v35 = vld [vmem:[#allocation7 + $0x54] ss:$8 sps:$4 sm:$0xff]  }
 0x101   :  { %1589 = vmatpush1.bf16.msra.mxu1 %v3218_v36  ;;  %1428 = vmatprep.subr.bf16.mxu0 %v3223_v37  ;;  %v3308_v36 = vld [vmem:[#allocation7 + $0x50] ss:$8 sps:$4 sm:$0xff]   ;;  %v3313_v37 = vld [vmem:[#allocation7 + $0x64] ss:$8 sps:$4 sm:$0xff]  }
 0x102   :  { %1590 = vmatprep.subr.bf16.mxu1 %v3226_v38  ;;  %v3311_v38 = vld [vmem:[#allocation7 + $0x60] ss:$8 sps:$4 sm:$0xff]  }
 0x104   :  { %1429 = vmatpush1.bf16.msra.mxu0 %v3221_v39 }
 0x105   :  { %1591 = vmatpush1.bf16.msra.mxu1 %v3224_v40  ;;  %1430 = vmatprep.subr.bf16.mxu0 %v3229_v41  ;;  %v3314_v41 = vld [vmem:[#allocation7 + $0x70] ss:$8 sps:$4 sm:$0xff]  }
 0x106   :  { %1592 = vmatprep.subr.bf16.mxu1 %v3232_v42 }
 0x108   :  { %1431 = vmatpush1.bf16.msra.mxu0 %v3227_v43  ;;  %v3319_v43 = vld [vmem:[#allocation7 + $0x84] ss:$8 sps:$4 sm:$0xff]  }
 0x109   :  { %1593 = vmatpush1.bf16.msra.mxu1 %v3230_v44  ;;  %1432 = vmatprep.subr.bf16.mxu0 %v3235_v45  ;;  %v3322_v45 = vld [vmem:[#allocation7 + $0x94] ss:$8 sps:$4 sm:$0xff]  }
 0x10a   :  { %1594 = vmatprep.subr.bf16.mxu1 %v3238_v46  ;;  %v3320_v46 = vld [vmem:[#allocation7 + $0x90] ss:$8 sps:$4 sm:$0xff]  }
 0x10c   :  { %1433 = vmatpush1.bf16.msra.mxu0 %v3233_v47  ;;  %v3325_v47 = vld [vmem:[#allocation7 + $0xa4] ss:$8 sps:$4 sm:$0xff]  }
 0x10d   :  { %1595 = vmatpush1.bf16.msra.mxu1 %v3236_v48  ;;  %1434 = vmatprep.subr.bf16.mxu0 %v3241_v49  ;;  %v3323_v48 = vld [vmem:[#allocation7 + $0xa0] ss:$8 sps:$4 sm:$0xff]   ;;  %v3328_v49 = vld [vmem:[#allocation7 + $0xb4] ss:$8 sps:$4 sm:$0xff]  }
 0x10e   :  { %1596 = vmatprep.subr.bf16.mxu1 %v3244_v50  ;;  %v3326_v50 = vld [vmem:[#allocation7 + $0xb0] ss:$8 sps:$4 sm:$0xff]  }
 0x110   :  { %1435 = vmatpush1.bf16.msra.mxu0 %v3239_v51  ;;  %v3331_v51 = vld [vmem:[#allocation7 + $0xc4] ss:$8 sps:$4 sm:$0xff]  }
 0x111   :  { %1597 = vmatpush1.bf16.msra.mxu1 %v3242_v52  ;;  %1436 = vmatprep.subr.bf16.mxu0 %v3247_v53  ;;  %v3329_v52 = vld [vmem:[#allocation7 + $0xc0] ss:$8 sps:$4 sm:$0xff]   ;;  %v3334_v53 = vld [vmem:[#allocation7 + $0xd4] ss:$8 sps:$4 sm:$0xff]  }
 0x112   :  { %1598 = vmatprep.subr.bf16.mxu1 %v3250_v54  ;;  %v3332_v54 = vld [vmem:[#allocation7 + $0xd0] ss:$8 sps:$4 sm:$0xff]  }
 0x114   :  { %1437 = vmatpush1.bf16.msra.mxu0 %v3245_v55  ;;  %v3337_v55 = vld [vmem:[#allocation7 + $0xe4] ss:$8 sps:$4 sm:$0xff]  }
 0x115   :  { %1599 = vmatpush1.bf16.msra.mxu1 %v3248_v56  ;;  %1438 = vmatprep.subr.bf16.mxu0 %v3253_v57  ;;  %v3335_v56 = vld [vmem:[#allocation7 + $0xe0] ss:$8 sps:$4 sm:$0xff]   ;;  %v3340_v57 = vld [vmem:[#allocation7 + $0xf4] ss:$8 sps:$4 sm:$0xff]  }
 0x116   :  { %1600 = vmatprep.subr.bf16.mxu1 %v3256_v58  ;;  %v3338_v58 = vld [vmem:[#allocation7 + $0xf0] ss:$8 sps:$4 sm:$0xff]  }
 0x118   :  { %1439 = vmatpush1.bf16.msra.mxu0 %v3251_v59  ;;  %v3343_v59 = vld [vmem:[#allocation7 + $0x104] ss:$8 sps:$4 sm:$0xff]  }
 0x119   :  { %1601 = vmatpush1.bf16.msra.mxu1 %v3254_v60  ;;  %1440 = vmatprep.subr.bf16.mxu0 %v3259_v61  ;;  %v3389_v60 = vld [vmem:[#allocation8 + $0x40] sm:$0xff]  }
 0x11a   :  { %1602 = vmatprep.subr.bf16.mxu1 %v3262_v62  ;;  %v3390_v61 = vld [vmem:[#allocation8] sm:$0xff]   ;;  %v3391_v62 = vld [vmem:[#allocation8 + $0x48] sm:$0xff]  }
 0x11c   :  { %1441 = vmatpush1.bf16.msra.mxu0 %v3257_v63  ;;  %v3392_v63 = vld [vmem:[#allocation8 + $0x8] sm:$0xff]  }
 0x11d   :  { %1603 = vmatpush1.bf16.msra.mxu1 %v3260_v1  ;;  %1442 = vmatprep.subr.bf16.mxu0 %v3265_v2  ;;  %v3393_v1 = vld [vmem:[#allocation8 + $0x50] sm:$0xff]  }
 0x11e   :  { %1604 = vmatprep.subr.bf16.mxu1 %v3268_v3  ;;  %v3394_v2 = vld [vmem:[#allocation8 + $0x10] sm:$0xff]   ;;  %v3395_v3 = vld [vmem:[#allocation8 + $0x58] sm:$0xff]  }
 0x120   :  { %1443 = vmatpush1.bf16.msra.mxu0 %v3263_v4  ;;  %v3396_v4 = vld [vmem:[#allocation8 + $0x18] sm:$0xff]  }
 0x121   :  { %1605 = vmatpush1.bf16.msra.mxu1 %v3266_v5  ;;  %1444 = vmatprep.subr.bf16.mxu0 %v3271_v6  ;;  %v3397_v5 = vld [vmem:[#allocation8 + $0x60] sm:$0xff]  }
 0x122   :  { %1606 = vmatprep.subr.bf16.mxu1 %v3274_v7  ;;  %v3398_v6 = vld [vmem:[#allocation8 + $0x20] sm:$0xff]   ;;  %v3399_v7 = vld [vmem:[#allocation8 + $0x68] sm:$0xff]  }
 0x124   :  { %1445 = vmatpush1.bf16.msra.mxu0 %v3269_v8  ;;  %v3400_v8 = vld [vmem:[#allocation8 + $0x28] sm:$0xff]  }
 0x125   :  { %1607 = vmatpush1.bf16.msra.mxu1 %v3272_v9  ;;  %1446 = vmatprep.subr.bf16.mxu0 %v3277_v11  ;;  %v332_v9 = vlaneseq }
 0x126   :  { %1608 = vmatprep.subr.bf16.mxu1 %v3280_v12 }
 0x127   :  { %v3768_v11 = vshrl.u32 %v332_v9, 7  ;;  %v3401_v9 = vld [vmem:[#allocation8 + $0x70] sm:$0xff]  }
 0x128   :  { %1447 = vmatpush1.bf16.msra.mxu0 %v3275_v13  ;;  %v3774_v13 = vld [vmem:[%s3837_s2] sm:$0xf] }
 0x129   :  { %1609 = vmatpush1.bf16.msra.mxu1 %v3278_v14  ;;  %1448 = vmatprep.subr.bf16.mxu0 %v3283_v15  ;;  %v334_v12 = vsub.s32 0, %v3768_v11  ;;  %v338_v14 = vsub.s32 1, %v3768_v11 }
 0x12a   :  { %1610 = vmatprep.subr.bf16.mxu1 %v3286_v16 }
 0x12b   :  { %v335_v15 = vrot.slane %v3774_v13, %v334_v12  ;;  %v339_v16 = vrot.slane %v3774_v13, %v338_v14 }
 0x12c   :  { %1449 = vmatpush1.bf16.msra.mxu0 %v3281_v17 }
 0x12d   :  { %1611 = vmatpush1.bf16.msra.mxu1 %v3284_v19  ;;  %2068 = vmatprep.subr.bf16.mxu0 %v3295_v20 }
 0x12e   :  { %1612 = vmatprep.subr.bf16.mxu1 %v3289_v21 }
 0x12f   :  { %1451 = vmatmul.mubr.bf16.vlgmr.msra.gmra.mrb[0].mxu0 %v131_v22 }
 0x130   :  { %2069 = vmatpush1.bf16.msra.mxu0 %v3293_v23 }
 0x131   :  { %1613 = vmatpush1.bf16.msra.mxu1 %v3287_v24  ;;  %2070 = vmatprep.subr.bf16.mxu0 %v3298_v25 }
 0x132   :  { %1623 = vmatprep.subr.bf16.mxu1 %v3292_v26 }
 0x134   :  { %1615 = vmatmul.mubr.bf16.vlgmr.msra.gmra.mrb[4].mxu1 %v131_v22  ;;  %2071 = vmatpush1.bf16.msra.mxu0 %v3296_v27 }
 0x135   :  { %1624 = vmatpush1.bf16.msra.mxu1 %v3290_v28  ;;  %1655 = vmatprep.mubr.bf16.mxu1 %v3597_v0  ;;  %v3316_v0 = vld [vmem:[#allocation7 + $0x74] ss:$8 sps:$4 sm:$0xff]   ;;  %v3341_v28 = vld [vmem:[#allocation7 + $0x100] ss:$8 sps:$4 sm:$0xff]  }
 0x136   :  { %2072 = vmatprep.subr.bf16.mxu0 %v3301_v29  ;;  %2871 = vmatprep.subr.bf16.mxu1 %v3389_v60  ;;  %v3377_v60 = vld [vmem:[#allocation7 + $0x1c0] ss:$8 sps:$4 sm:$0xff]  }
 0x138   :  { %2073 = vmatpush1.bf16.msra.mxu0 %v3299_v30  ;;  %v3346_v30 = vld [vmem:[#allocation7 + $0x114] ss:$8 sps:$4 sm:$0xff]  }
 0x139   :  { %2074 = vmatprep.subr.bf16.mxu0 %v3304_v31  ;;  %v346_v31 = vsub.s32 3, %v3768_v11 }
 0x13c   :  { %2075 = vmatpush1.bf16.msra.mxu0 %v3302_v32  ;;  %v3344_v32 = vld [vmem:[#allocation7 + $0x110] ss:$8 sps:$4 sm:$0xff]  }
 0x13d   :  { %2076 = vmatprep.subr.bf16.mxu0 %v3307_v33  ;;  %v3349_v33 = vld [vmem:[#allocation7 + $0x124] ss:$8 sps:$4 sm:$0xff]  }
 0x140   :  { %2771 = vmatmul.mubr.msk.bf16.vlgmr.msra.gmra.mrb[4].mxu1 %vm1332_vm0, %v3757_v10  ;;  %2077 = vmatpush1.bf16.msra.mxu0 %v3305_v34  ;;  %v3317_v10 = vld [vmem:[#allocation7 + $0x80] ss:$8 sps:$4 sm:$0xff]   ;;  %v347_v34 = vrot.slane %v3774_v13, %v346_v31 }
 0x141   :  { %2078 = vmatprep.subr.bf16.mxu0 %v3310_v35  ;;  %2872 = vmatpush3.bf16.msra.mxu1 %v3390_v61  ;;  %v3347_v35 = vld [vmem:[#allocation7 + $0x120] ss:$8 sps:$4 sm:$0xff]   ;;  %v342_v61 = vsub.s32 2, %v3768_v11  ;;  %v3407_v11 = vld [vmem:[#allocation10 + $0x10] sm:$0xff]  }
 0x142   :  { %2873 = vmatprep.subr.bf16.mxu1 %v3391_v62  ;;  %v3382_v62 = vld [vmem:[#allocation7 + $0x1d4] ss:$8 sps:$4 sm:$0xff]  }
 0x144   :  { %2079 = vmatpush1.bf16.msra.mxu0 %v3308_v36 }
 0x145   :  { %2080 = vmatprep.subr.bf16.mxu0 %v3313_v37  ;;  %2874 = vmatpush3.bf16.msra.mxu1 %v3392_v63  ;;  %v3352_v37 = vld [vmem:[#allocation7 + $0x134] ss:$8 sps:$4 sm:$0xff]   ;;  %v3380_v63 = vld [vmem:[#allocation7 + $0x1d0] ss:$8 sps:$4 sm:$0xff]  }
 0x146   :  { %2875 = vmatprep.subr.bf16.mxu1 %v3393_v1  ;;  %v343_v1 = vrot.slane %v3774_v13, %v342_v61  ;;  %v3404_v13 = vld [vmem:[#allocation8 + $0x38] sm:$0xff]  }
 0x147   :  { %v3764_v39 = vpop.f32.mrb[0].mxu1 }
 0x148   :  { %v3766_v40 = vpop.f32.mrb[1].mxu1  ;;  %2081 = vmatpush1.bf16.msra.mxu0 %v3311_v38 }
 0x149   :  { %v1497_v42 = vpop.f32.mrb[2].mxu1  ;;  %2082 = vmatprep.subr.bf16.mxu0 %v3316_v0  ;;  %2876 = vmatpush3.bf16.msra.mxu1 %v3394_v2  ;;  %v3385_v2 = vld [vmem:[#allocation7 + $0x1e4] ss:$8 sps:$4 sm:$0xff]  }
 0x14a   :  { %v1498_v44 = vpop.f32.mrb[3].mxu1  ;;  %2877 = vmatprep.subr.bf16.mxu1 %v3395_v3  ;;  %v3383_v3 = vld [vmem:[#allocation7 + $0x1e0] ss:$8 sps:$4 sm:$0xff]  }
 0x14c   :  { %2083 = vmatpush1.bf16.msra.mxu0 %v3314_v41  ;;  %v3350_v41 = vld [vmem:[#allocation7 + $0x130] ss:$8 sps:$4 sm:$0xff]  }
 0x14d   :  { %2084 = vmatprep.subr.bf16.mxu0 %v3319_v43  ;;  %2878 = vmatpush3.bf16.msra.mxu1 %v3396_v4  ;;  %v3355_v43 = vld [vmem:[#allocation7 + $0x144] ss:$8 sps:$4 sm:$0xff]  }
 0x14e   :  { %2879 = vmatprep.subr.bf16.mxu1 %v3397_v5  ;;  %v3388_v5 = vld [vmem:[#allocation7 + $0x1f4] ss:$8 sps:$4 sm:$0xff]  }
 0x150   :  { %2085 = vmatpush1.bf16.msra.mxu0 %v3317_v10  ;;  %v3353_v10 = vld [vmem:[#allocation7 + $0x140] ss:$8 sps:$4 sm:$0xff]  }
 0x151   :  { %2086 = vmatprep.subr.bf16.mxu0 %v3322_v45  ;;  %2880 = vmatpush3.bf16.msra.mxu1 %v3398_v6  ;;  %v3358_v45 = vld [vmem:[#allocation7 + $0x154] ss:$8 sps:$4 sm:$0xff]   ;;  %v3386_v6 = vld [vmem:[#allocation7 + $0x1f0] ss:$8 sps:$4 sm:$0xff]  }
 0x152   :  { %2881 = vmatprep.subr.bf16.mxu1 %v3399_v7 }
 0x154   :  { %2087 = vmatpush1.bf16.msra.mxu0 %v3320_v46  ;;  %v3356_v46 = vld [vmem:[#allocation7 + $0x150] ss:$8 sps:$4 sm:$0xff]  }
 0x155   :  { %2088 = vmatprep.subr.bf16.mxu0 %v3325_v47  ;;  %2882 = vmatpush3.bf16.msra.mxu1 %v3400_v8  ;;  %v3361_v47 = vld [vmem:[#allocation7 + $0x164] ss:$8 sps:$4 sm:$0xff]  }
 0x156   :  { %2883 = vmatprep.subr.bf16.mxu1 %v3401_v9 }
 0x158   :  { %2089 = vmatpush1.bf16.msra.mxu0 %v3323_v48  ;;  %v3359_v48 = vld [vmem:[#allocation7 + $0x160] ss:$8 sps:$4 sm:$0xff]  }
 0x159   :  { %2090 = vmatprep.subr.bf16.mxu0 %v3328_v49  ;;  %v3364_v49 = vld [vmem:[#allocation7 + $0x174] ss:$8 sps:$4 sm:$0xff]  }
 0x15c   :  { %2091 = vmatpush1.bf16.msra.mxu0 %v3326_v50  ;;  %v3362_v50 = vld [vmem:[#allocation7 + $0x170] ss:$8 sps:$4 sm:$0xff]  }
 0x15d   :  { %2092 = vmatprep.subr.bf16.mxu0 %v3331_v51  ;;  %v3367_v51 = vld [vmem:[#allocation7 + $0x184] ss:$8 sps:$4 sm:$0xff]  }
 0x160   :  { %2093 = vmatpush1.bf16.msra.mxu0 %v3329_v52  ;;  %v3365_v52 = vld [vmem:[#allocation7 + $0x180] ss:$8 sps:$4 sm:$0xff]  }
 0x161   :  { %2094 = vmatprep.subr.bf16.mxu0 %v3334_v53  ;;  %v3370_v53 = vld [vmem:[#allocation7 + $0x194] ss:$8 sps:$4 sm:$0xff]  }
 0x164   :  { %2095 = vmatpush1.bf16.msra.mxu0 %v3332_v54  ;;  %v3368_v54 = vld [vmem:[#allocation7 + $0x190] ss:$8 sps:$4 sm:$0xff]  }
 0x165   :  { %2096 = vmatprep.subr.bf16.mxu0 %v3337_v55  ;;  %v3373_v55 = vld [vmem:[#allocation7 + $0x1a4] ss:$8 sps:$4 sm:$0xff]  }
 0x168   :  { %2097 = vmatpush1.bf16.msra.mxu0 %v3335_v56  ;;  %v3371_v56 = vld [vmem:[#allocation7 + $0x1a0] ss:$8 sps:$4 sm:$0xff]  }
 0x169   :  { %2098 = vmatprep.subr.bf16.mxu0 %v3340_v57  ;;  %v3376_v57 = vld [vmem:[#allocation7 + $0x1b4] ss:$8 sps:$4 sm:$0xff]  }
 0x16c   :  { %2099 = vmatpush1.bf16.msra.mxu0 %v3338_v58  ;;  %v3374_v58 = vld [vmem:[#allocation7 + $0x1b0] ss:$8 sps:$4 sm:$0xff]  }
 0x16d   :  { %2109 = vmatprep.subr.bf16.mxu0 %v3343_v59  ;;  %v3379_v59 = vld [vmem:[#allocation7 + $0x1c4] ss:$8 sps:$4 sm:$0xff]  }
 0x202   :  { %v1452_v17 = vpop.f32.mrb[0].mxu0 }
 0x203   :  { %v2951_v18 = vadd.f32 %v1452_v17, %v335_v15  ;;  %v1454_v19 = vpop.f32.mrb[1].mxu0  ;;  %v3402_v15 = vld [vmem:[#allocation8 + $0x30] sm:$0xff]   ;;  %v3598_v17 = vmov 0.0  }
 0x204   :  { %v2953_v20 = vadd.f32 %v1454_v19, %v339_v16  ;;  %v1456_v21 = vpop.f32.mrb[2].mxu0  ;;  %2884 = vmatpush3.bf16.msra.mxu1 %v3402_v15  ;;  %v3403_v16 = vld [vmem:[#allocation8 + $0x78] sm:$0xff]  }
 0x205   :  { %v2952_v22 = vadd.f32 %v2951_v18, %v3764_v39  ;;  %v1457_v23 = vpop.f32.mrb[3].mxu0  ;;  %2885 = vmatprep.subr.bf16.mxu1 %v3403_v16  ;;  %v1736_v18 = vld [vmem:[%s3839_s4] sm:$0x3] }
 0x206   :  { %v2954_v24 = vadd.f32 %v2953_v20, %v3766_v40  ;;  %v1741_v19 = vrot.slane %v1736_v18, %v334_v12  ;;  %v1745_v20 = vrot.slane %v1736_v18, %v338_v14  ;;  %v3408_v12 = vld [vmem:[#allocation10 + $0x18] sm:$0xff]   ;;  %v3409_v14 = vld [vmem:[#allocation10 + $0x20] sm:$0xff]  }
 0x207   :  { %v1664_v25 = vmax.f32 %v2952_v22, 0.0 }
 0x208   :  { %v1665_v26 = vmax.f32 %v2954_v24, 0.0  ;;  %2886 = vmatpush3.bf16.msra.mxu1 %v3404_v13 }
 0x209   :  { %v1668_v29 = vpack.c.bf16 %v1664_v25, %v1664_v25  ;;  %2911 = vmatprep.subr.bf16.mxu1 %v3598_v17 }
 0x20a   :  { %v1669_v27 = vpack.c.bf16 %v1665_v26, %v1665_v26 }
 0x20c   :  { %2100 = vmatprep.mubr.bf16.mxu0 %v1669_v27 }
 0x20d   :  { %2101 = vmatmul.mubr.bf16.vlgmr.msra.gmra.mrb[4].mxu0 %v1668_v29 }
 0x20e   :  { %2110 = vmatpush1.bf16.msra.mxu0 %v3341_v28 }
 0x20f   :  { %2111 = vmatprep.subr.bf16.mxu0 %v3346_v30  ;;  %v3405_v30 = vld [vmem:[#allocation10] sm:$0xff]  }
 0x212   :  { %2112 = vmatpush1.bf16.msra.mxu0 %v3344_v32  ;;  %v3406_v32 = vld [vmem:[#allocation10 + $0x8] sm:$0xff]  }
 0x213   :  { %v1657_v36 = vpop.f32.mrb[4].mxu1  ;;  %2113 = vmatprep.subr.bf16.mxu0 %v3349_v33  ;;  %v3410_v33 = vld [vmem:[#allocation10 + $0x28] sm:$0xff]  }
 0x214   :  { %v1659_v38 = vpop.f32.mrb[5].mxu1  ;;  %v2955_v4 = vadd.f32 %v1657_v36, %v343_v1 }
 0x215   :  { %v2956_v0 = vadd.f32 %v1659_v38, %v347_v34  ;;  %v1661_v39 = vpop.f32.mrb[6].mxu1  ;;  %v3411_v34 = vld [vmem:[#allocation10 + $0x30] sm:$0xff]  }
 0x216   :  { %v1662_v40 = vpop.f32.mrb[7].mxu1  ;;  %2114 = vmatpush1.bf16.msra.mxu0 %v3347_v35  ;;  %v1666_v7 = vmax.f32 %v2955_v4, 0.0  ;;  %v3412_v35 = vld [vmem:[#allocation10 + $0x38] sm:$0xff]  }
 0x217   :  { %v1667_v42 = vmax.f32 %v2956_v0, 0.0  ;;  %2115 = vmatprep.subr.bf16.mxu0 %v3352_v37  ;;  %v2836_v37 = vld [vmem:[%s3841_s6] ss:$0 sm:$0xff] }
 0x218   :  { %v1670_v8 = vpack.c.bf16 %v1666_v7, %v1666_v7 }
 0x219   :  { %v1671_v44 = vpack.c.bf16 %v1667_v42, %v1667_v42 }
 0x21a   :  { %2116 = vmatpush1.bf16.msra.mxu0 %v3350_v41 }
 0x21b   :  { %2141 = vmatprep.mubr.bf16.mxu0 %v1671_v44  ;;  %2117 = vmatprep.subr.bf16.mxu0 %v3355_v43  ;;  %v3413_v43 = vld [vmem:[#allocation11] sm:$0xff]  }
 0x21e   :  { %2118 = vmatpush1.bf16.msra.mxu0 %v3353_v10  ;;  %v3414_v10 = vld [vmem:[#allocation11 + $0x8] sm:$0xff]  }
 0x21f   :  { %2119 = vmatprep.subr.bf16.mxu0 %v3358_v45  ;;  %v3415_v45 = vld [vmem:[#allocation11 + $0x10] sm:$0xff]  }
 0x222   :  { %2120 = vmatpush1.bf16.msra.mxu0 %v3356_v46  ;;  %v3416_v46 = vld [vmem:[#allocation11 + $0x18] sm:$0xff]  }
 0x223   :  { %2121 = vmatprep.subr.bf16.mxu0 %v3361_v47  ;;  %v3417_v47 = vld [vmem:[#allocation11 + $0x20] sm:$0xff]  }
 0x226   :  { %2122 = vmatpush1.bf16.msra.mxu0 %v3359_v48  ;;  %v3418_v48 = vld [vmem:[#allocation11 + $0x28] sm:$0xff]  }
 0x227   :  { %2123 = vmatprep.subr.bf16.mxu0 %v3364_v49  ;;  %v3419_v49 = vld [vmem:[#allocation11 + $0x30] sm:$0xff]  }
 0x22a   :  { %2124 = vmatpush1.bf16.msra.mxu0 %v3362_v50  ;;  %v3420_v50 = vld [vmem:[#allocation11 + $0x38] sm:$0xff]  }
 0x22b   :  { %2125 = vmatprep.subr.bf16.mxu0 %v3367_v51  ;;  %v2853_v51 = vld [vmem:[%s3843_s8] ss:$0 sm:$0xff]  ;;  %s3553_s8 = scalar_lea.vmem %s2563_s20, 128 }
 0x22c   :  { %p3554_p6 = scmp.ne.s32.totalorder %s2563_s20, %s3553_s8  ;;  %p3559_p8 = scmp.lt.s32.totalorder %s3553_s8, %s3553_s8 }
 0x22e   :  { %2126 = vmatpush1.bf16.msra.mxu0 %v3365_v52  ;;  %p3560_p9 = por %p3559_p8, %p3558_p7 }
 0x22f   :  { %2127 = vmatprep.subr.bf16.mxu0 %v3370_v53 }
 0x230   :  { %p3561_p10 = pnand %p3560_p9, %p3554_p6 }
 0x232   :  { %2128 = vmatpush1.bf16.msra.mxu0 %v3368_v54 }
 0x233   :  { %2129 = vmatprep.subr.bf16.mxu0 %v3373_v55 }
 0x236   :  { %2130 = vmatpush1.bf16.msra.mxu0 %v3371_v56 }
 0x237   :  { %2131 = vmatprep.subr.bf16.mxu0 %v3376_v57 }
 0x23a   :  { %2132 = vmatpush1.bf16.msra.mxu0 %v3374_v58 }
 0x23b   :  { %2133 = vmatprep.subr.bf16.mxu0 %v3379_v59  ;;  %v2862_v59 = vld [vmem:[%s3845_s10] ss:$0 sm:$0xff] }
 0x23e   :  { %2134 = vmatpush1.bf16.msra.mxu0 %v3377_v60 }
 0x23f   :  { %2135 = vmatprep.subr.bf16.mxu0 %v3382_v62 }
 0x242   :  { %2136 = vmatpush1.bf16.msra.mxu0 %v3380_v63 }
 0x243   :  { %2137 = vmatprep.subr.bf16.mxu0 %v3385_v2 }
 0x246   :  { %2138 = vmatpush1.bf16.msra.mxu0 %v3383_v3 }
 0x247   :  { %2139 = vmatprep.subr.bf16.mxu0 %v3388_v5 }
 0x24a   :  { %2140 = vmatpush1.bf16.msra.mxu0 %v3386_v6 }
 0x24d   :  { %2142 = vmatmul.mubr.bf16.vlgmr.msra.gmra.mrb[4].mxu0 %v1670_v8 }
 0x320   :  { %v2143_v21 = vpop.f32.mrb[4].mxu0 }
 0x321   :  { %v2957_v22 = vadd.f32 %v2143_v21, %v1741_v19  ;;  %v2145_v23 = vpop.f32.mrb[5].mxu0 }
 0x322   :  { %v2958_v24 = vadd.f32 %v2145_v23, %v1745_v20  ;;  %v2147_v25 = vpop.f32.mrb[6].mxu0 }
 0x323   :  { %v2150_v26 = vmax.f32 %v2957_v22, 0.0  ;;  %v2148_v27 = vpop.f32.mrb[7].mxu0 }
 0x324   :  { %v2151_v28 = vmax.f32 %v2958_v24, 0.0 }
 0x325   :  { %v2152_v31 = vpack.c.bf16 %v2150_v26, %v2150_v26 }
 0x326   :  { %v2153_v29 = vpack.c.bf16 %v2151_v28, %v2151_v28 }
 0x328   :  { %2321 = vmatprep.mubr.bf16.mxu1 %v2153_v29 }
 0x329   :  { %2322 = vmatmul.mubr.bf16.vlgmr.msra.gmra.mrb[8].mxu1 %v2152_v31 }
 0x32a   :  { %2912 = vmatpush3.bf16.msra.mxu1 %v3405_v30  ;;  %2927 = vmatprep.mubr.msk.bf16.mxu1 %vm3599_vm1, %v3598_v17 }
 0x32b   :  { %2913 = vmatprep.subr.bf16.mxu1 %v3598_v17 }
 0x32e   :  { %2914 = vmatpush3.bf16.msra.mxu1 %v3406_v32 }
 0x32f   :  { %2915 = vmatprep.subr.bf16.mxu1 %v3598_v17 }
 0x332   :  { %2916 = vmatpush3.bf16.msra.mxu1 %v3407_v11 }
 0x333   :  { %2917 = vmatprep.subr.bf16.mxu1 %v3598_v17 }
 0x336   :  { %2918 = vmatpush3.bf16.msra.mxu1 %v3408_v12 }
 0x337   :  { %2919 = vmatprep.subr.bf16.mxu1 %v3598_v17 }
 0x33a   :  { %2920 = vmatpush3.bf16.msra.mxu1 %v3409_v14 }
 0x33b   :  { %2921 = vmatprep.subr.bf16.mxu1 %v3598_v17 }
 0x33e   :  { %2922 = vmatpush3.bf16.msra.mxu1 %v3410_v33 }
 0x33f   :  { %2923 = vmatprep.subr.bf16.mxu1 %v3598_v17 }
 0x342   :  { %2924 = vmatpush3.bf16.msra.mxu1 %v3411_v34 }
 0x343   :  { %2925 = vmatprep.subr.bf16.mxu1 %v3598_v17 }
 0x346   :  { %2926 = vmatpush3.bf16.msra.mxu1 %v3412_v35 }
 0x347   :  { %2931 = vmatprep.subr.bf16.mxu1 %v3598_v17 }
 0x3fc   :  { %v2887_v36 = vpop.f32.mrb[8].mxu1 }
 0x3fd   :  { %v2888_v38 = vpop.f32.mrb[9].mxu1 }
 0x3fe   :  { %v2889_v0 = vadd.f32 %v2888_v38, %v2887_v36  ;;  %v2890_v39 = vpop.f32.mrb[10].mxu1 }
 0x3ff   :  { %v2891_v40 = vpop.f32.mrb[11].mxu1 }
 0x400   :  { %v2324_v41 = vadd.f32 %v2889_v0, %v2836_v37 }
 0x402   :  { %v2329_v42 = vmax.f32 %v2324_v41, 0.0 }
 0x404   :  { %v2330_v44 = vpack.c.bf16 %v2329_v42, %v2329_v42 }
 0x406   :  { %2928 = vmatmul.mubr.bf16.vlgmr.msra.gmra.mrb[12].mxu1 %v2330_v44 }
 0x407   :  { %2932 = vmatpush3.bf16.msra.mxu1 %v3413_v43  ;;  %2947 = vmatprep.mubr.msk.bf16.mxu1 %vm3599_vm1, %v3598_v17 }
 0x408   :  { %2933 = vmatprep.subr.bf16.mxu1 %v3598_v17 }
 0x40b   :  { %2934 = vmatpush3.bf16.msra.mxu1 %v3414_v10 }
 0x40c   :  { %2935 = vmatprep.subr.bf16.mxu1 %v3598_v17 }
 0x40f   :  { %2936 = vmatpush3.bf16.msra.mxu1 %v3415_v45 }
 0x410   :  { %2937 = vmatprep.subr.bf16.mxu1 %v3598_v17 }
 0x413   :  { %2938 = vmatpush3.bf16.msra.mxu1 %v3416_v46 }
 0x414   :  { %2939 = vmatprep.subr.bf16.mxu1 %v3598_v17 }
 0x417   :  { %2940 = vmatpush3.bf16.msra.mxu1 %v3417_v47 }
 0x418   :  { %2941 = vmatprep.subr.bf16.mxu1 %v3598_v17 }
 0x41b   :  { %2942 = vmatpush3.bf16.msra.mxu1 %v3418_v48 }
 0x41c   :  { %2943 = vmatprep.subr.bf16.mxu1 %v3598_v17 }
 0x41f   :  { %2944 = vmatpush3.bf16.msra.mxu1 %v3419_v49 }
 0x420   :  { %2945 = vmatprep.subr.bf16.mxu1 %v3598_v17 }
 0x423   :  { %2946 = vmatpush3.bf16.msra.mxu1 %v3420_v50 }
 0x4d9   :  { %v2436_v52 = vpop.f32.mrb[12].mxu1 }
 0x4da   :  { %v2437_v53 = vadd.f32 %v2853_v51, %v2436_v52  ;;  %v2929_v54 = vpop.f32.mrb[13].mxu1 }
 0x4db   :  { %v2439_v55 = vpop.f32.mrb[14].mxu1 }
 0x4dc   :  { %v2442_v56 = vmax.f32 %v2437_v53, 0.0  ;;  %v2930_v57 = vpop.f32.mrb[15].mxu1 }
 0x4de   :  { %v2443_v58 = vpack.c.bf16 %v2442_v56, %v2442_v56 }
 0x4e0   :  { %2948 = vmatmul.mubr.bf16.vlgmr.msra.gmra.mrb[16].mxu1 %v2443_v58 }
 0x5b3   :  { %v2549_v60 = vpop.f32.mrb[16].mxu1 }
 0x5b4   :  { %v2550_v61 = vadd.f32 %v2862_v59, %v2549_v60  ;;  %v2949_v62 = vpop.f32.mrb[17].mxu1 }
 0x5b5   :  { %v2552_v63 = vpop.f32.mrb[18].mxu1 }
 0x5b6   :  { %2555 = vst [vmem:[#allocation13] sm:$0xff] %v2550_v61  ;;  %v2950_v1 = vpop.f32.mrb[19].mxu1 }
 0x5b7   :  { %3564 = shalt.err (!%p3561_p10)
}
 0x5b8   :  { %s3565_s10 = scalar_lea.hbm %s3846_s11, 128 }
 0x5b9   :  { %p3566_p11 = scmp.ne.s32.totalorder %s3846_s11, %s3565_s10  ;;  %p3569_p12 = scmp.lt.u32.totalorder %s3565_s10, %s3846_s11 }
 0x5bb   :  { %p3571_p13 = pnand %p3569_p12, %p3566_p11 }
 0x5bd   :  { %3574 = shalt.err (!%p3571_p13)
}
 0x5be   :  { %2565 = dma.vmem_to_hbm [thread:$0]  %s2563_s20, 128, %s3846_s11, [#allocation4]  }
 0x5bf   :  { %3583 = dma.done.wait [#allocation4], 128  }
 0x5c0   :  { %3584 = vsyncadd [#allocation4], 4294967168 }
 0x5c1   :  { %2569 = vsyncpa [#allocation3], 1 }
 0x5c2   :  { %2570 = vsyncpa [#allocation6], 1 }
 0x5c3   :  { %2571 = vsyncpa [#allocation9], 1 }
 0x5c4   :  { %2572 = vsyncpa [#allocation12], 1 }
 0x5c5   :  { %2573 = vsyncpa [#allocation4], 1 }

</bundles_post_ra>
